<compile_context>
chip_gen: v7x
topology: tpu7x:2x2x1
jax: 0.10.0
libtpu: 0.0.40
codegen_flags: <defaults>
</compile_context>

<pallas_src>
import math
from functools import partial

import jax
import jax.numpy as jnp
from jax import lax
from jax.experimental import pallas as pl
from jax.experimental.pallas import tpu as pltpu


def _erf_f32(x):
    # f32 rational approximation of erf (same family as Eigen/XLA's f32 erf),
    # accurate to ~1e-7 over the clamped range -> exact-GELU semantics at f32.
    x = jnp.clip(x, -4.0, 4.0)
    x2 = x * x
    alpha = (-2.72614225801306e-10, 2.77068142495902e-08, -2.10102402082508e-06,
             -5.69250639462346e-05, -7.34990630326855e-04, -2.95459980854025e-03,
             -1.60960333262415e-02)
    beta = (-1.45660718464996e-05, -2.13374055278905e-04, -1.68282697438203e-03,
            -7.37332916720468e-03, -1.42647390514189e-02)
    p = jnp.full_like(x2, alpha[0])
    for a in alpha[1:]:
        p = p * x2 + a
    q = jnp.full_like(x2, beta[0])
    for b in beta[1:]:
        q = q * x2 + b
    return (x * p) / q


def _layer_norm(x, w, b, eps=1e-5):
    mean = jnp.mean(x, axis=-1, keepdims=True)
    c = x - mean
    var = jnp.mean(c * c, axis=-1, keepdims=True)
    return c * lax.rsqrt(var + eps) * w + b


def transformer_block_kernel(x_ref, ln1_w_ref, ln1_b_ref,
                             wq_ref, bq_ref, wk_ref, bk_ref, wv_ref, bv_ref,
                             wo_ref, bo_ref, ln2_w_ref, ln2_b_ref,
                             w1_ref, b1_ref, w2_ref, b2_ref,
                             o_ref, *, heads):
    f32 = jnp.float32
    bf16 = jnp.bfloat16

    S = x_ref.shape[1]
    TS = o_ref.shape[1]          # query-tile rows handled by this grid step
    D = x_ref.shape[2]
    dh = D // heads
    scale = 1.0 / math.sqrt(dh)

    qs = pl.multiple_of(pl.program_id(1) * TS, 8)     # sublane-aligned tile start

    x_all = x_ref[0]                                  # (S, D)  full sequence (for K/V)
    x_q = x_ref[0, pl.ds(qs, TS), :]                  # (TS, D) query-tile rows

    ln1_w = ln1_w_ref[...]
    ln1_b = ln1_b_ref[...]
    xn_all = _layer_norm(x_all, ln1_w, ln1_b).astype(bf16)
    xn_q = _layer_norm(x_q, ln1_w, ln1_b).astype(bf16)

    # --- projections: bf16 operands, f32 accumulation on the MXU ---
    k = jnp.dot(xn_all, wk_ref[...], preferred_element_type=f32) + bk_ref[...]
    v = jnp.dot(xn_all, wv_ref[...], preferred_element_type=f32) + bv_ref[...]
    q = jnp.dot(xn_q, wq_ref[...], preferred_element_type=f32) + bq_ref[...]
    q = q * scale                                     # fold 1/sqrt(dh) into q once

    # --- per-head attention: true (TS,dh)x(dh,S) / (TS,S)x(S,dh) contractions ---
    # TODO(synk): for large `heads`, move to a (heads, S, dh) layout + lax.fori_loop.
    head_outs = []
    for h in range(heads):
        lo = h * dh
        qh = lax.slice_in_dim(q, lo, lo + dh, axis=1).astype(bf16)   # (TS, dh)
        kh = lax.slice_in_dim(k, lo, lo + dh, axis=1).astype(bf16)   # (S, dh)
        vh = lax.slice_in_dim(v, lo, lo + dh, axis=1).astype(bf16)   # (S, dh)

        s = lax.dot_general(qh, kh, (((1,), (1,)), ((), ())),
                            preferred_element_type=f32)              # (TS, S)
        s = s - jnp.max(s, axis=-1, keepdims=True)
        p = jnp.exp(s)
        inv = pl.reciprocal(jnp.sum(p, axis=-1, keepdims=True), approx=True)
        p = p * inv
        head_outs.append(jnp.dot(p.astype(bf16), vh,
                                 preferred_element_type=f32))         # (TS, dh)
    attn = jnp.concatenate(head_outs, axis=-1)                        # (TS, D)

    attn = jnp.dot(attn.astype(bf16), wo_ref[...],
                   preferred_element_type=f32) + bo_ref[...]
    x1 = x_q + attn

    # --- FFN branch (f32 LN/GELU, bf16 matmul operands) ---
    xn2 = _layer_norm(x1, ln2_w_ref[...], ln2_b_ref[...]).astype(bf16)
    h1 = jnp.dot(xn2, w1_ref[...], preferred_element_type=f32) + b1_ref[...]
    g = 0.5 * h1 * (1.0 + _erf_f32(h1 * 0.7071067811865476))         # exact (erf) GELU
    y = jnp.dot(g.astype(bf16), w2_ref[...],
                preferred_element_type=f32) + b2_ref[...]

    o_ref[0] = x1 + y


def _pick_seq_tile(S, max_tile=256):
    # biggest multiple-of-8 tile (<= max_tile) that evenly divides S; else the full S.
    for cand in (max_tile, 256, 128, 64, 32, 16, 8):
        if cand % 8 == 0 and cand <= S and S % cand == 0:
            return cand
    return S


def transformer_block(x, params, heads, *, max_seq_tile=256):
    B, S, D = x.shape
    D4 = 4 * D
    assert D % heads == 0, "model dim must be divisible by heads"
    # TODO(synk): if D % 128 != 0 at realistic sizes, pad D (and 4*D) to a multiple of 128
    #             lanes at the wrapper level for lane-dense stores; not needed for typical
    #             transformer widths (768/1024/...).

    ts = _pick_seq_tile(S, max_seq_tile)
    nq = S // ts
    bf16 = jnp.bfloat16

    # Grid-invariant weights/biases: single-buffered (no point double-buffering a block
    # whose index never changes; halves their VMEM footprint).
    def wspec(shape):
        zeros = (0,) * len(shape)
        return pl.BlockSpec(shape, lambda b, q, _z=zeros: _z,
                            pipeline_mode=pl.Buffered(1))

    in_specs = [
        pl.BlockSpec((1, S, D), lambda b, q: (b, 0, 0)),   # x (full seq; re-fetched only per b)
        wspec((1, D)), wspec((1, D)),                      # ln1 w, b
        wspec((D, D)), wspec((1, D)),                      # wq, bq
        wspec((D, D)), wspec((1, D)),                      # wk, bk
        wspec((D, D)), wspec((1, D)),                      # wv, bv
        wspec((D, D)), wspec((1, D)),                      # wo, bo
        wspec((1, D)), wspec((1, D)),                      # ln2 w, b
        wspec((D, D4)), wspec((1, D4)),                    # ffn w1, b1
        wspec((D4, D)), wspec((1, D)),                     # ffn w2, b2
    ]
    out_spec = pl.BlockSpec((1, ts, D), lambda b, q: (b, q, 0))

    kernel = partial(transformer_block_kernel, heads=heads)
    return pl.pallas_call(
        kernel,
        out_shape=jax.ShapeDtypeStruct((B, S, D), jnp.float32),
        grid=(B, nq),
        in_specs=in_specs,
        out_specs=out_spec,
        compiler_params=pltpu.CompilerParams(
            dimension_semantics=("parallel", "parallel"),
            vmem_limit_bytes=48 * 1024 * 1024),
    )(x,
      params["ln1_w"], params["ln1_b"],
      params["wq"].astype(bf16), params["bq"],
      params["wk"].astype(bf16), params["bk"],
      params["wv"].astype(bf16), params["bv"],
      params["wo"].astype(bf16), params["bo"],
      params["ln2_w"], params["ln2_b"],
      params["w1"].astype(bf16), params["b1"],
      params["w2"].astype(bf16), params["b2"])


def reference(x, p, heads, *, mixed=False):
    # Pure-JAX reference matching PyTorch semantics.
    # mixed=True mirrors the kernel's bf16-operand / f32-accumulate matmuls.
    f32 = jnp.float32
    hp = dict(precision=lax.Precision.HIGHEST, preferred_element_type=f32)

    def cast(a):
        return a.astype(jnp.bfloat16) if mixed else a

    def dot(a, w):
        return jnp.einsum("bsd,de->bse", cast(a), cast(w), **hp)

    def ln(t, w, b):
        m = t.mean(-1, keepdims=True)
        c = t - m
        v = (c * c).mean(-1, keepdims=True)
        return c * lax.rsqrt(v + 1e-5) * w + b

    B, S, D = x.shape
    dh = D // heads
    xn = ln(x, p["ln1_w"], p["ln1_b"])
    q = dot(xn, p["wq"]) + p["bq"]
    k = dot(xn, p["wk"]) + p["bk"]
    v = dot(xn, p["wv"]) + p["bv"]
    qh = (q / math.sqrt(dh)).reshape(B, S, heads, dh)
    kh = k.reshape(B, S, heads, dh)
    vh = v.reshape(B, S, heads, dh)
    s = jnp.einsum("bqhd,bkhd->bhqk", cast(qh), cast(kh), **hp)
    a = jax.nn.softmax(s.astype(f32), axis=-1)
    o = jnp.einsum("bhqk,bkhd->bqhd", cast(a), cast(vh), **hp).reshape(B, S, D)
    o = dot(o, p["wo"]) + p["bo"]
    x1 = x + o
    xn2 = ln(x1, p["ln2_w"], p["ln2_b"])
    h1 = dot(xn2, p["w1"]) + p["b1"]
    g = 0.5 * h1 * (1.0 + jax.scipy.special.erf(h1 * 0.7071067811865476))
    y = dot(g, p["w2"]) + p["b2"]
    return x1 + y


if __name__ == "__main__":
    B, S, D, H = 2, 8, 32, 8
    key = jax.random.PRNGKey(0)
    ks = jax.random.split(key, 13)
    sc = 0.05
    f32 = jnp.float32

    params = dict(
        ln1_w=jnp.ones((1, D), f32), ln1_b=jnp.zeros((1, D), f32),
        wq=sc * jax.random.normal(ks[0], (D, D), f32),
        bq=sc * jax.random.normal(ks[1], (1, D), f32),
        wk=sc * jax.random.normal(ks[2], (D, D), f32),
        bk=sc * jax.random.normal(ks[3], (1, D), f32),
        wv=sc * jax.random.normal(ks[4], (D, D), f32),
        bv=sc * jax.random.normal(ks[5], (1, D), f32),
        wo=sc * jax.random.normal(ks[6], (D, D), f32),
        bo=sc * jax.random.normal(ks[7], (1, D), f32),
        ln2_w=jnp.ones((1, D), f32), ln2_b=jnp.zeros((1, D), f32),
        w1=sc * jax.random.normal(ks[8], (D, 4 * D), f32),
        b1=sc * jax.random.normal(ks[9], (1, 4 * D), f32),
        w2=sc * jax.random.normal(ks[10], (4 * D, D), f32),
        b2=sc * jax.random.normal(ks[11], (1, D), f32),
    )
    x = jax.random.normal(ks[12], (B, S, D), f32)

    out = transformer_block(x, params, heads=H)
    out = jax.block_until_ready(out)

    ref_mixed = reference(x, params, H, mixed=True)    # same bf16-matmul numerics as kernel
    ref_f32 = reference(x, params, H, mixed=False)     # exact-f32 PyTorch semantics

    assert out.shape == (B, S, D)
    assert bool(jnp.all(jnp.isfinite(out)))
    err_tight = float(jnp.max(jnp.abs(out - ref_mixed)))
    err_loose = float(jnp.max(jnp.abs(out - ref_f32)))
    assert bool(jnp.allclose(out, ref_mixed, atol=5e-3, rtol=5e-3)), \
        f"vs bf16-matched reference: max abs diff {err_tight}"
    assert bool(jnp.allclose(out, ref_f32, atol=2e-2, rtol=2e-2)), \
        f"vs f32 reference: max abs diff {err_loose}"

    print("KERNEL_OK")
</pallas_src>

<mosaic_0001>
module attributes {stable_mosaic.version = 11 : i64} {
  func.func @transformer_block_kernel(%arg0: i32, %arg1: i32, %arg2: memref<1x8x32xf32, #tpu.memory_space<vmem>>, %arg3: memref<1x32xf32, #tpu.memory_space<vmem>>, %arg4: memref<1x32xf32, #tpu.memory_space<vmem>>, %arg5: memref<32x32xbf16, #tpu.memory_space<vmem>>, %arg6: memref<1x32xf32, #tpu.memory_space<vmem>>, %arg7: memref<32x32xbf16, #tpu.memory_space<vmem>>, %arg8: memref<1x32xf32, #tpu.memory_space<vmem>>, %arg9: memref<32x32xbf16, #tpu.memory_space<vmem>>, %arg10: memref<1x32xf32, #tpu.memory_space<vmem>>, %arg11: memref<32x32xbf16, #tpu.memory_space<vmem>>, %arg12: memref<1x32xf32, #tpu.memory_space<vmem>>, %arg13: memref<1x32xf32, #tpu.memory_space<vmem>>, %arg14: memref<1x32xf32, #tpu.memory_space<vmem>>, %arg15: memref<32x128xbf16, #tpu.memory_space<vmem>>, %arg16: memref<1x128xf32, #tpu.memory_space<vmem>>, %arg17: memref<128x32xbf16, #tpu.memory_space<vmem>>, %arg18: memref<1x32xf32, #tpu.memory_space<vmem>>, %arg19: memref<1x8x32xf32, #tpu.memory_space<vmem>>) attributes {dimension_semantics = [#tpu.dimension_semantics<parallel>, #tpu.dimension_semantics<parallel>], iteration_bounds = array<i64: 2, 1>, scalar_prefetch = 0 : i64, scratch_operands = 0 : i64, tpu.core_type = #tpu.core_type<tc>, window_params = [{transform_indices = @transform_0, window_bounds = array<i64: 1, 8, 32>}, {pipeline_mode = #tpu.pipeline_mode<synchronous>, transform_indices = @transform_1, window_bounds = array<i64: 1, 32>}, {pipeline_mode = #tpu.pipeline_mode<synchronous>, transform_indices = @transform_2, window_bounds = array<i64: 1, 32>}, {pipeline_mode = #tpu.pipeline_mode<synchronous>, transform_indices = @transform_3, window_bounds = array<i64: 32, 32>}, {pipeline_mode = #tpu.pipeline_mode<synchronous>, transform_indices = @transform_4, window_bounds = array<i64: 1, 32>}, {pipeline_mode = #tpu.pipeline_mode<synchronous>, transform_indices = @transform_5, window_bounds = array<i64: 32, 32>}, {pipeline_mode = #tpu.pipeline_mode<synchronous>, transform_indices = @transform_6, window_bounds = array<i64: 1, 32>}, {pipeline_mode = #tpu.pipeline_mode<synchronous>, transform_indices = @transform_7, window_bounds = array<i64: 32, 32>}, {pipeline_mode = #tpu.pipeline_mode<synchronous>, transform_indices = @transform_8, window_bounds = array<i64: 1, 32>}, {pipeline_mode = #tpu.pipeline_mode<synchronous>, transform_indices = @transform_9, window_bounds = array<i64: 32, 32>}, {pipeline_mode = #tpu.pipeline_mode<synchronous>, transform_indices = @transform_10, window_bounds = array<i64: 1, 32>}, {pipeline_mode = #tpu.pipeline_mode<synchronous>, transform_indices = @transform_11, window_bounds = array<i64: 1, 32>}, {pipeline_mode = #tpu.pipeline_mode<synchronous>, transform_indices = @transform_12, window_bounds = array<i64: 1, 32>}, {pipeline_mode = #tpu.pipeline_mode<synchronous>, transform_indices = @transform_13, window_bounds = array<i64: 32, 128>}, {pipeline_mode = #tpu.pipeline_mode<synchronous>, transform_indices = @transform_14, window_bounds = array<i64: 1, 128>}, {pipeline_mode = #tpu.pipeline_mode<synchronous>, transform_indices = @transform_15, window_bounds = array<i64: 128, 32>}, {pipeline_mode = #tpu.pipeline_mode<synchronous>, transform_indices = @transform_16, window_bounds = array<i64: 1, 32>}, {transform_indices = @transform_17, window_bounds = array<i64: 1, 8, 32>}]} {
    %c8_i32 = arith.constant 8 : i32
    %0 = arith.muli %arg1, %c8_i32 : i32
    %1 = tpu.assume_multiple %0, 8 : i32
    %c0 = arith.constant 0 : index
    %c0_0 = arith.constant 0 : index
    %c0_1 = arith.constant 0 : index
    %2 = vector.load %arg2[%c0, %c0_0, %c0_1] : memref<1x8x32xf32, #tpu.memory_space<vmem>>, vector<1x8x32xf32>
    %3 = vector.shape_cast %2 : vector<1x8x32xf32> to vector<8x32xf32>
    %c0_2 = arith.constant 0 : index
    %4 = arith.index_cast %1 : i32 to index
    %c0_3 = arith.constant 0 : index
    %5 = vector.load %arg2[%c0_2, %4, %c0_3] : memref<1x8x32xf32, #tpu.memory_space<vmem>>, vector<1x8x32xf32>
    %6 = vector.shape_cast %5 : vector<1x8x32xf32> to vector<8x32xf32>
    %c0_4 = arith.constant 0 : index
    %c0_5 = arith.constant 0 : index
    %7 = vector.load %arg3[%c0_4, %c0_5] : memref<1x32xf32, #tpu.memory_space<vmem>>, vector<1x32xf32>
    %c0_6 = arith.constant 0 : index
    %c0_7 = arith.constant 0 : index
    %8 = vector.load %arg4[%c0_6, %c0_7] : memref<1x32xf32, #tpu.memory_space<vmem>>, vector<1x32xf32>
    %cst = arith.constant dense<0.000000e+00> : vector<8xf32>
    %9 = vector.multi_reduction <add>, %3, %cst [1] : vector<8x32xf32> to vector<8xf32>
    %10 = vector.shape_cast %9 : vector<8xf32> to vector<8x1xf32>
    %cst_8 = arith.constant 3.200000e+01 : f32
    %11 = vector.broadcast %cst_8 : f32 to vector<8x1xf32>
    %12 = arith.divf %10, %11 : vector<8x1xf32>
    %13 = vector.broadcast %12 : vector<8x1xf32> to vector<8x32xf32>
    %14 = arith.subf %3, %13 : vector<8x32xf32>
    %15 = arith.mulf %14, %14 : vector<8x32xf32>
    %cst_9 = arith.constant dense<0.000000e+00> : vector<8xf32>
    %16 = vector.multi_reduction <add>, %15, %cst_9 [1] : vector<8x32xf32> to vector<8xf32>
    %17 = vector.shape_cast %16 : vector<8xf32> to vector<8x1xf32>
    %cst_10 = arith.constant 3.200000e+01 : f32
    %18 = vector.broadcast %cst_10 : f32 to vector<8x1xf32>
    %19 = arith.divf %17, %18 : vector<8x1xf32>
    %cst_11 = arith.constant 9.99999974E-6 : f32
    %20 = vector.broadcast %cst_11 : f32 to vector<8x1xf32>
    %21 = arith.addf %19, %20 : vector<8x1xf32>
    %22 = math.rsqrt %21 : vector<8x1xf32>
    %23 = vector.broadcast %22 : vector<8x1xf32> to vector<8x32xf32>
    %24 = arith.mulf %14, %23 : vector<8x32xf32>
    %25 = vector.broadcast %7 : vector<1x32xf32> to vector<8x32xf32>
    %26 = arith.mulf %24, %25 : vector<8x32xf32>
    %27 = vector.broadcast %8 : vector<1x32xf32> to vector<8x32xf32>
    %28 = arith.addf %26, %27 : vector<8x32xf32>
    %29 = arith.truncf %28 : vector<8x32xf32> to vector<8x32xbf16>
    %cst_12 = arith.constant dense<0.000000e+00> : vector<8xf32>
    %30 = vector.multi_reduction <add>, %6, %cst_12 [1] : vector<8x32xf32> to vector<8xf32>
    %31 = vector.shape_cast %30 : vector<8xf32> to vector<8x1xf32>
    %cst_13 = arith.constant 3.200000e+01 : f32
    %32 = vector.broadcast %cst_13 : f32 to vector<8x1xf32>
    %33 = arith.divf %31, %32 : vector<8x1xf32>
    %34 = vector.broadcast %33 : vector<8x1xf32> to vector<8x32xf32>
    %35 = arith.subf %6, %34 : vector<8x32xf32>
    %36 = arith.mulf %35, %35 : vector<8x32xf32>
    %cst_14 = arith.constant dense<0.000000e+00> : vector<8xf32>
    %37 = vector.multi_reduction <add>, %36, %cst_14 [1] : vector<8x32xf32> to vector<8xf32>
    %38 = vector.shape_cast %37 : vector<8xf32> to vector<8x1xf32>
    %cst_15 = arith.constant 3.200000e+01 : f32
    %39 = vector.broadcast %cst_15 : f32 to vector<8x1xf32>
    %40 = arith.divf %38, %39 : vector<8x1xf32>
    %cst_16 = arith.constant 9.99999974E-6 : f32
    %41 = vector.broadcast %cst_16 : f32 to vector<8x1xf32>
    %42 = arith.addf %40, %41 : vector<8x1xf32>
    %43 = math.rsqrt %42 : vector<8x1xf32>
    %44 = vector.broadcast %43 : vector<8x1xf32> to vector<8x32xf32>
    %45 = arith.mulf %35, %44 : vector<8x32xf32>
    %46 = vector.broadcast %7 : vector<1x32xf32> to vector<8x32xf32>
    %47 = arith.mulf %45, %46 : vector<8x32xf32>
    %48 = vector.broadcast %8 : vector<1x32xf32> to vector<8x32xf32>
    %49 = arith.addf %47, %48 : vector<8x32xf32>
    %50 = arith.truncf %49 : vector<8x32xf32> to vector<8x32xbf16>
    %c0_17 = arith.constant 0 : index
    %c0_18 = arith.constant 0 : index
    %51 = vector.load %arg7[%c0_17, %c0_18] : memref<32x32xbf16, #tpu.memory_space<vmem>>, vector<32x32xbf16>
    %cst_19 = arith.constant dense<0.000000e+00> : vector<8x32xf32>
    %52 = tpu.matmul %29, %51, %cst_19 {dimension_numbers = #tpu.dot_dimension_numbers<[1], [0], [0], [1], [0, 0, 1, 1], [], []>} : vector<8x32xbf16>, vector<32x32xbf16>, vector<8x32xf32> -> vector<8x32xf32>
    %c0_20 = arith.constant 0 : index
    %c0_21 = arith.constant 0 : index
    %53 = vector.load %arg8[%c0_20, %c0_21] : memref<1x32xf32, #tpu.memory_space<vmem>>, vector<1x32xf32>
    %54 = vector.broadcast %53 : vector<1x32xf32> to vector<8x32xf32>
    %55 = arith.addf %52, %54 : vector<8x32xf32>
    %c0_22 = arith.constant 0 : index
    %c0_23 = arith.constant 0 : index
    %56 = vector.load %arg9[%c0_22, %c0_23] : memref<32x32xbf16, #tpu.memory_space<vmem>>, vector<32x32xbf16>
    %cst_24 = arith.constant dense<0.000000e+00> : vector<8x32xf32>
    %57 = tpu.matmul %29, %56, %cst_24 {dimension_numbers = #tpu.dot_dimension_numbers<[1], [0], [0], [1], [0, 0, 1, 1], [], []>} : vector<8x32xbf16>, vector<32x32xbf16>, vector<8x32xf32> -> vector<8x32xf32>
    %c0_25 = arith.constant 0 : index
    %c0_26 = arith.constant 0 : index
    %58 = vector.load %arg10[%c0_25, %c0_26] : memref<1x32xf32, #tpu.memory_space<vmem>>, vector<1x32xf32>
    %59 = vector.broadcast %58 : vector<1x32xf32> to vector<8x32xf32>
    %60 = arith.addf %57, %59 : vector<8x32xf32>
    %c0_27 = arith.constant 0 : index
    %c0_28 = arith.constant 0 : index
    %61 = vector.load %arg5[%c0_27, %c0_28] : memref<32x32xbf16, #tpu.memory_space<vmem>>, vector<32x32xbf16>
    %cst_29 = arith.constant dense<0.000000e+00> : vector<8x32xf32>
    %62 = tpu.matmul %50, %61, %cst_29 {dimension_numbers = #tpu.dot_dimension_numbers<[1], [0], [0], [1], [0, 0, 1, 1], [], []>} : vector<8x32xbf16>, vector<32x32xbf16>, vector<8x32xf32> -> vector<8x32xf32>
    %c0_30 = arith.constant 0 : index
    %c0_31 = arith.constant 0 : index
    %63 = vector.load %arg6[%c0_30, %c0_31] : memref<1x32xf32, #tpu.memory_space<vmem>>, vector<1x32xf32>
    %64 = vector.broadcast %63 : vector<1x32xf32> to vector<8x32xf32>
    %65 = arith.addf %62, %64 : vector<8x32xf32>
    %cst_32 = arith.constant 5.000000e-01 : f32
    %66 = vector.broadcast %cst_32 : f32 to vector<8x32xf32>
    %67 = arith.mulf %65, %66 : vector<8x32xf32>
    %68 = vector.extract_strided_slice %67 {offsets = [0, 0], sizes = [8, 4], strides = [1, 1]} : vector<8x32xf32> to vector<8x4xf32>
    %69 = arith.truncf %68 : vector<8x4xf32> to vector<8x4xbf16>
    %70 = vector.extract_strided_slice %55 {offsets = [0, 0], sizes = [8, 4], strides = [1, 1]} : vector<8x32xf32> to vector<8x4xf32>
    %71 = arith.truncf %70 : vector<8x4xf32> to vector<8x4xbf16>
    %72 = vector.extract_strided_slice %60 {offsets = [0, 0], sizes = [8, 4], strides = [1, 1]} : vector<8x32xf32> to vector<8x4xf32>
    %73 = arith.truncf %72 : vector<8x4xf32> to vector<8x4xbf16>
    %cst_33 = arith.constant dense<0.000000e+00> : vector<8x8xf32>
    %74 = tpu.matmul %69, %71, %cst_33 {dimension_numbers = #tpu.dot_dimension_numbers<[1], [1], [0], [0], [0, 0, 1, 0], [], []>} : vector<8x4xbf16>, vector<8x4xbf16>, vector<8x8xf32> -> vector<8x8xf32>
    %cst_34 = arith.constant dense<0xFF800000> : vector<8xf32>
    %75 = vector.multi_reduction <maximumf>, %74, %cst_34 [1] : vector<8x8xf32> to vector<8xf32>
    %76 = vector.shape_cast %75 : vector<8xf32> to vector<8x1xf32>
    %77 = vector.broadcast %76 : vector<8x1xf32> to vector<8x8xf32>
    %78 = arith.subf %74, %77 : vector<8x8xf32>
    %79 = math.exp %78 : vector<8x8xf32>
    %cst_35 = arith.constant dense<0.000000e+00> : vector<8xf32>
    %80 = vector.multi_reduction <add>, %79, %cst_35 [1] : vector<8x8xf32> to vector<8xf32>
    %81 = vector.shape_cast %80 : vector<8xf32> to vector<8x1xf32>
    %82 = tpu.reciprocal %81 {approx = true} : vector<8x1xf32> -> vector<8x1xf32>
    %83 = vector.broadcast %82 : vector<8x1xf32> to vector<8x8xf32>
    %84 = arith.mulf %79, %83 : vector<8x8xf32>
    %85 = arith.truncf %84 : vector<8x8xf32> to vector<8x8xbf16>
    %cst_36 = arith.constant dense<0.000000e+00> : vector<8x4xf32>
    %86 = tpu.matmul %85, %73, %cst_36 {dimension_numbers = #tpu.dot_dimension_numbers<[1], [0], [0], [1], [0, 0, 1, 1], [], []>} : vector<8x8xbf16>, vector<8x4xbf16>, vector<8x4xf32> -> vector<8x4xf32>
    %87 = vector.extract_strided_slice %67 {offsets = [0, 4], sizes = [8, 4], strides = [1, 1]} : vector<8x32xf32> to vector<8x4xf32>
    %88 = arith.truncf %87 : vector<8x4xf32> to vector<8x4xbf16>
    %89 = vector.extract_strided_slice %55 {offsets = [0, 4], sizes = [8, 4], strides = [1, 1]} : vector<8x32xf32> to vector<8x4xf32>
    %90 = arith.truncf %89 : vector<8x4xf32> to vector<8x4xbf16>
    %91 = vector.extract_strided_slice %60 {offsets = [0, 4], sizes = [8, 4], strides = [1, 1]} : vector<8x32xf32> to vector<8x4xf32>
    %92 = arith.truncf %91 : vector<8x4xf32> to vector<8x4xbf16>
    %cst_37 = arith.constant dense<0.000000e+00> : vector<8x8xf32>
    %93 = tpu.matmul %88, %90, %cst_37 {dimension_numbers = #tpu.dot_dimension_numbers<[1], [1], [0], [0], [0, 0, 1, 0], [], []>} : vector<8x4xbf16>, vector<8x4xbf16>, vector<8x8xf32> -> vector<8x8xf32>
    %cst_38 = arith.constant dense<0xFF800000> : vector<8xf32>
    %94 = vector.multi_reduction <maximumf>, %93, %cst_38 [1] : vector<8x8xf32> to vector<8xf32>
    %95 = vector.shape_cast %94 : vector<8xf32> to vector<8x1xf32>
    %96 = vector.broadcast %95 : vector<8x1xf32> to vector<8x8xf32>
    %97 = arith.subf %93, %96 : vector<8x8xf32>
    %98 = math.exp %97 : vector<8x8xf32>
    %cst_39 = arith.constant dense<0.000000e+00> : vector<8xf32>
    %99 = vector.multi_reduction <add>, %98, %cst_39 [1] : vector<8x8xf32> to vector<8xf32>
    %100 = vector.shape_cast %99 : vector<8xf32> to vector<8x1xf32>
    %101 = tpu.reciprocal %100 {approx = true} : vector<8x1xf32> -> vector<8x1xf32>
    %102 = vector.broadcast %101 : vector<8x1xf32> to vector<8x8xf32>
    %103 = arith.mulf %98, %102 : vector<8x8xf32>
    %104 = arith.truncf %103 : vector<8x8xf32> to vector<8x8xbf16>
    %cst_40 = arith.constant dense<0.000000e+00> : vector<8x4xf32>
    %105 = tpu.matmul %104, %92, %cst_40 {dimension_numbers = #tpu.dot_dimension_numbers<[1], [0], [0], [1], [0, 0, 1, 1], [], []>} : vector<8x8xbf16>, vector<8x4xbf16>, vector<8x4xf32> -> vector<8x4xf32>
    %106 = vector.extract_strided_slice %67 {offsets = [0, 8], sizes = [8, 4], strides = [1, 1]} : vector<8x32xf32> to vector<8x4xf32>
    %107 = arith.truncf %106 : vector<8x4xf32> to vector<8x4xbf16>
    %108 = vector.extract_strided_slice %55 {offsets = [0, 8], sizes = [8, 4], strides = [1, 1]} : vector<8x32xf32> to vector<8x4xf32>
    %109 = arith.truncf %108 : vector<8x4xf32> to vector<8x4xbf16>
    %110 = vector.extract_strided_slice %60 {offsets = [0, 8], sizes = [8, 4], strides = [1, 1]} : vector<8x32xf32> to vector<8x4xf32>
    %111 = arith.truncf %110 : vector<8x4xf32> to vector<8x4xbf16>
    %cst_41 = arith.constant dense<0.000000e+00> : vector<8x8xf32>
    %112 = tpu.matmul %107, %109, %cst_41 {dimension_numbers = #tpu.dot_dimension_numbers<[1], [1], [0], [0], [0, 0, 1, 0], [], []>} : vector<8x4xbf16>, vector<8x4xbf16>, vector<8x8xf32> -> vector<8x8xf32>
    %cst_42 = arith.constant dense<0xFF800000> : vector<8xf32>
    %113 = vector.multi_reduction <maximumf>, %112, %cst_42 [1] : vector<8x8xf32> to vector<8xf32>
    %114 = vector.shape_cast %113 : vector<8xf32> to vector<8x1xf32>
    %115 = vector.broadcast %114 : vector<8x1xf32> to vector<8x8xf32>
    %116 = arith.subf %112, %115 : vector<8x8xf32>
    %117 = math.exp %116 : vector<8x8xf32>
    %cst_43 = arith.constant dense<0.000000e+00> : vector<8xf32>
    %118 = vector.multi_reduction <add>, %117, %cst_43 [1] : vector<8x8xf32> to vector<8xf32>
    %119 = vector.shape_cast %118 : vector<8xf32> to vector<8x1xf32>
    %120 = tpu.reciprocal %119 {approx = true} : vector<8x1xf32> -> vector<8x1xf32>
    %121 = vector.broadcast %120 : vector<8x1xf32> to vector<8x8xf32>
    %122 = arith.mulf %117, %121 : vector<8x8xf32>
    %123 = arith.truncf %122 : vector<8x8xf32> to vector<8x8xbf16>
    %cst_44 = arith.constant dense<0.000000e+00> : vector<8x4xf32>
    %124 = tpu.matmul %123, %111, %cst_44 {dimension_numbers = #tpu.dot_dimension_numbers<[1], [0], [0], [1], [0, 0, 1, 1], [], []>} : vector<8x8xbf16>, vector<8x4xbf16>, vector<8x4xf32> -> vector<8x4xf32>
    %125 = vector.extract_strided_slice %67 {offsets = [0, 12], sizes = [8, 4], strides = [1, 1]} : vector<8x32xf32> to vector<8x4xf32>
    %126 = arith.truncf %125 : vector<8x4xf32> to vector<8x4xbf16>
    %127 = vector.extract_strided_slice %55 {offsets = [0, 12], sizes = [8, 4], strides = [1, 1]} : vector<8x32xf32> to vector<8x4xf32>
    %128 = arith.truncf %127 : vector<8x4xf32> to vector<8x4xbf16>
    %129 = vector.extract_strided_slice %60 {offsets = [0, 12], sizes = [8, 4], strides = [1, 1]} : vector<8x32xf32> to vector<8x4xf32>
    %130 = arith.truncf %129 : vector<8x4xf32> to vector<8x4xbf16>
    %cst_45 = arith.constant dense<0.000000e+00> : vector<8x8xf32>
    %131 = tpu.matmul %126, %128, %cst_45 {dimension_numbers = #tpu.dot_dimension_numbers<[1], [1], [0], [0], [0, 0, 1, 0], [], []>} : vector<8x4xbf16>, vector<8x4xbf16>, vector<8x8xf32> -> vector<8x8xf32>
    %cst_46 = arith.constant dense<0xFF800000> : vector<8xf32>
    %132 = vector.multi_reduction <maximumf>, %131, %cst_46 [1] : vector<8x8xf32> to vector<8xf32>
    %133 = vector.shape_cast %132 : vector<8xf32> to vector<8x1xf32>
    %134 = vector.broadcast %133 : vector<8x1xf32> to vector<8x8xf32>
    %135 = arith.subf %131, %134 : vector<8x8xf32>
    %136 = math.exp %135 : vector<8x8xf32>
    %cst_47 = arith.constant dense<0.000000e+00> : vector<8xf32>
    %137 = vector.multi_reduction <add>, %136, %cst_47 [1] : vector<8x8xf32> to vector<8xf32>
    %138 = vector.shape_cast %137 : vector<8xf32> to vector<8x1xf32>
    %139 = tpu.reciprocal %138 {approx = true} : vector<8x1xf32> -> vector<8x1xf32>
    %140 = vector.broadcast %139 : vector<8x1xf32> to vector<8x8xf32>
    %141 = arith.mulf %136, %140 : vector<8x8xf32>
    %142 = arith.truncf %141 : vector<8x8xf32> to vector<8x8xbf16>
    %cst_48 = arith.constant dense<0.000000e+00> : vector<8x4xf32>
    %143 = tpu.matmul %142, %130, %cst_48 {dimension_numbers = #tpu.dot_dimension_numbers<[1], [0], [0], [1], [0, 0, 1, 1], [], []>} : vector<8x8xbf16>, vector<8x4xbf16>, vector<8x4xf32> -> vector<8x4xf32>
    %144 = vector.extract_strided_slice %67 {offsets = [0, 16], sizes = [8, 4], strides = [1, 1]} : vector<8x32xf32> to vector<8x4xf32>
    %145 = arith.truncf %144 : vector<8x4xf32> to vector<8x4xbf16>
    %146 = vector.extract_strided_slice %55 {offsets = [0, 16], sizes = [8, 4], strides = [1, 1]} : vector<8x32xf32> to vector<8x4xf32>
    %147 = arith.truncf %146 : vector<8x4xf32> to vector<8x4xbf16>
    %148 = vector.extract_strided_slice %60 {offsets = [0, 16], sizes = [8, 4], strides = [1, 1]} : vector<8x32xf32> to vector<8x4xf32>
    %149 = arith.truncf %148 : vector<8x4xf32> to vector<8x4xbf16>
    %cst_49 = arith.constant dense<0.000000e+00> : vector<8x8xf32>
    %150 = tpu.matmul %145, %147, %cst_49 {dimension_numbers = #tpu.dot_dimension_numbers<[1], [1], [0], [0], [0, 0, 1, 0], [], []>} : vector<8x4xbf16>, vector<8x4xbf16>, vector<8x8xf32> -> vector<8x8xf32>
    %cst_50 = arith.constant dense<0xFF800000> : vector<8xf32>
    %151 = vector.multi_reduction <maximumf>, %150, %cst_50 [1] : vector<8x8xf32> to vector<8xf32>
    %152 = vector.shape_cast %151 : vector<8xf32> to vector<8x1xf32>
    %153 = vector.broadcast %152 : vector<8x1xf32> to vector<8x8xf32>
    %154 = arith.subf %150, %153 : vector<8x8xf32>
    %155 = math.exp %154 : vector<8x8xf32>
    %cst_51 = arith.constant dense<0.000000e+00> : vector<8xf32>
    %156 = vector.multi_reduction <add>, %155, %cst_51 [1] : vector<8x8xf32> to vector<8xf32>
    %157 = vector.shape_cast %156 : vector<8xf32> to vector<8x1xf32>
    %158 = tpu.reciprocal %157 {approx = true} : vector<8x1xf32> -> vector<8x1xf32>
    %159 = vector.broadcast %158 : vector<8x1xf32> to vector<8x8xf32>
    %160 = arith.mulf %155, %159 : vector<8x8xf32>
    %161 = arith.truncf %160 : vector<8x8xf32> to vector<8x8xbf16>
    %cst_52 = arith.constant dense<0.000000e+00> : vector<8x4xf32>
    %162 = tpu.matmul %161, %149, %cst_52 {dimension_numbers = #tpu.dot_dimension_numbers<[1], [0], [0], [1], [0, 0, 1, 1], [], []>} : vector<8x8xbf16>, vector<8x4xbf16>, vector<8x4xf32> -> vector<8x4xf32>
    %163 = vector.extract_strided_slice %67 {offsets = [0, 20], sizes = [8, 4], strides = [1, 1]} : vector<8x32xf32> to vector<8x4xf32>
    %164 = arith.truncf %163 : vector<8x4xf32> to vector<8x4xbf16>
    %165 = vector.extract_strided_slice %55 {offsets = [0, 20], sizes = [8, 4], strides = [1, 1]} : vector<8x32xf32> to vector<8x4xf32>
    %166 = arith.truncf %165 : vector<8x4xf32> to vector<8x4xbf16>
    %167 = vector.extract_strided_slice %60 {offsets = [0, 20], sizes = [8, 4], strides = [1, 1]} : vector<8x32xf32> to vector<8x4xf32>
    %168 = arith.truncf %167 : vector<8x4xf32> to vector<8x4xbf16>
    %cst_53 = arith.constant dense<0.000000e+00> : vector<8x8xf32>
    %169 = tpu.matmul %164, %166, %cst_53 {dimension_numbers = #tpu.dot_dimension_numbers<[1], [1], [0], [0], [0, 0, 1, 0], [], []>} : vector<8x4xbf16>, vector<8x4xbf16>, vector<8x8xf32> -> vector<8x8xf32>
    %cst_54 = arith.constant dense<0xFF800000> : vector<8xf32>
    %170 = vector.multi_reduction <maximumf>, %169, %cst_54 [1] : vector<8x8xf32> to vector<8xf32>
    %171 = vector.shape_cast %170 : vector<8xf32> to vector<8x1xf32>
    %172 = vector.broadcast %171 : vector<8x1xf32> to vector<8x8xf32>
    %173 = arith.subf %169, %172 : vector<8x8xf32>
    %174 = math.exp %173 : vector<8x8xf32>
    %cst_55 = arith.constant dense<0.000000e+00> : vector<8xf32>
    %175 = vector.multi_reduction <add>, %174, %cst_55 [1] : vector<8x8xf32> to vector<8xf32>
    %176 = vector.shape_cast %175 : vector<8xf32> to vector<8x1xf32>
    %177 = tpu.reciprocal %176 {approx = true} : vector<8x1xf32> -> vector<8x1xf32>
    %178 = vector.broadcast %177 : vector<8x1xf32> to vector<8x8xf32>
    %179 = arith.mulf %174, %178 : vector<8x8xf32>
    %180 = arith.truncf %179 : vector<8x8xf32> to vector<8x8xbf16>
    %cst_56 = arith.constant dense<0.000000e+00> : vector<8x4xf32>
    %181 = tpu.matmul %180, %168, %cst_56 {dimension_numbers = #tpu.dot_dimension_numbers<[1], [0], [0], [1], [0, 0, 1, 1], [], []>} : vector<8x8xbf16>, vector<8x4xbf16>, vector<8x4xf32> -> vector<8x4xf32>
    %182 = vector.extract_strided_slice %67 {offsets = [0, 24], sizes = [8, 4], strides = [1, 1]} : vector<8x32xf32> to vector<8x4xf32>
    %183 = arith.truncf %182 : vector<8x4xf32> to vector<8x4xbf16>
    %184 = vector.extract_strided_slice %55 {offsets = [0, 24], sizes = [8, 4], strides = [1, 1]} : vector<8x32xf32> to vector<8x4xf32>
    %185 = arith.truncf %184 : vector<8x4xf32> to vector<8x4xbf16>
    %186 = vector.extract_strided_slice %60 {offsets = [0, 24], sizes = [8, 4], strides = [1, 1]} : vector<8x32xf32> to vector<8x4xf32>
    %187 = arith.truncf %186 : vector<8x4xf32> to vector<8x4xbf16>
    %cst_57 = arith.constant dense<0.000000e+00> : vector<8x8xf32>
    %188 = tpu.matmul %183, %185, %cst_57 {dimension_numbers = #tpu.dot_dimension_numbers<[1], [1], [0], [0], [0, 0, 1, 0], [], []>} : vector<8x4xbf16>, vector<8x4xbf16>, vector<8x8xf32> -> vector<8x8xf32>
    %cst_58 = arith.constant dense<0xFF800000> : vector<8xf32>
    %189 = vector.multi_reduction <maximumf>, %188, %cst_58 [1] : vector<8x8xf32> to vector<8xf32>
    %190 = vector.shape_cast %189 : vector<8xf32> to vector<8x1xf32>
    %191 = vector.broadcast %190 : vector<8x1xf32> to vector<8x8xf32>
    %192 = arith.subf %188, %191 : vector<8x8xf32>
    %193 = math.exp %192 : vector<8x8xf32>
    %cst_59 = arith.constant dense<0.000000e+00> : vector<8xf32>
    %194 = vector.multi_reduction <add>, %193, %cst_59 [1] : vector<8x8xf32> to vector<8xf32>
    %195 = vector.shape_cast %194 : vector<8xf32> to vector<8x1xf32>
    %196 = tpu.reciprocal %195 {approx = true} : vector<8x1xf32> -> vector<8x1xf32>
    %197 = vector.broadcast %196 : vector<8x1xf32> to vector<8x8xf32>
    %198 = arith.mulf %193, %197 : vector<8x8xf32>
    %199 = arith.truncf %198 : vector<8x8xf32> to vector<8x8xbf16>
    %cst_60 = arith.constant dense<0.000000e+00> : vector<8x4xf32>
    %200 = tpu.matmul %199, %187, %cst_60 {dimension_numbers = #tpu.dot_dimension_numbers<[1], [0], [0], [1], [0, 0, 1, 1], [], []>} : vector<8x8xbf16>, vector<8x4xbf16>, vector<8x4xf32> -> vector<8x4xf32>
    %201 = vector.extract_strided_slice %67 {offsets = [0, 28], sizes = [8, 4], strides = [1, 1]} : vector<8x32xf32> to vector<8x4xf32>
    %202 = arith.truncf %201 : vector<8x4xf32> to vector<8x4xbf16>
    %203 = vector.extract_strided_slice %55 {offsets = [0, 28], sizes = [8, 4], strides = [1, 1]} : vector<8x32xf32> to vector<8x4xf32>
    %204 = arith.truncf %203 : vector<8x4xf32> to vector<8x4xbf16>
    %205 = vector.extract_strided_slice %60 {offsets = [0, 28], sizes = [8, 4], strides = [1, 1]} : vector<8x32xf32> to vector<8x4xf32>
    %206 = arith.truncf %205 : vector<8x4xf32> to vector<8x4xbf16>
    %cst_61 = arith.constant dense<0.000000e+00> : vector<8x8xf32>
    %207 = tpu.matmul %202, %204, %cst_61 {dimension_numbers = #tpu.dot_dimension_numbers<[1], [1], [0], [0], [0, 0, 1, 0], [], []>} : vector<8x4xbf16>, vector<8x4xbf16>, vector<8x8xf32> -> vector<8x8xf32>
    %cst_62 = arith.constant dense<0xFF800000> : vector<8xf32>
    %208 = vector.multi_reduction <maximumf>, %207, %cst_62 [1] : vector<8x8xf32> to vector<8xf32>
    %209 = vector.shape_cast %208 : vector<8xf32> to vector<8x1xf32>
    %210 = vector.broadcast %209 : vector<8x1xf32> to vector<8x8xf32>
    %211 = arith.subf %207, %210 : vector<8x8xf32>
    %212 = math.exp %211 : vector<8x8xf32>
    %cst_63 = arith.constant dense<0.000000e+00> : vector<8xf32>
    %213 = vector.multi_reduction <add>, %212, %cst_63 [1] : vector<8x8xf32> to vector<8xf32>
    %214 = vector.shape_cast %213 : vector<8xf32> to vector<8x1xf32>
    %215 = tpu.reciprocal %214 {approx = true} : vector<8x1xf32> -> vector<8x1xf32>
    %216 = vector.broadcast %215 : vector<8x1xf32> to vector<8x8xf32>
    %217 = arith.mulf %212, %216 : vector<8x8xf32>
    %218 = arith.truncf %217 : vector<8x8xf32> to vector<8x8xbf16>
    %cst_64 = arith.constant dense<0.000000e+00> : vector<8x4xf32>
    %219 = tpu.matmul %218, %206, %cst_64 {dimension_numbers = #tpu.dot_dimension_numbers<[1], [0], [0], [1], [0, 0, 1, 1], [], []>} : vector<8x8xbf16>, vector<8x4xbf16>, vector<8x4xf32> -> vector<8x4xf32>
    %220 = tpu.concatenate %86, %105, %124, %143, %162, %181, %200, %219 in 1 : vector<8x4xf32>, vector<8x4xf32>, vector<8x4xf32>, vector<8x4xf32>, vector<8x4xf32>, vector<8x4xf32>, vector<8x4xf32>, vector<8x4xf32> -> vector<8x32xf32>
    %221 = arith.truncf %220 : vector<8x32xf32> to vector<8x32xbf16>
    %c0_65 = arith.constant 0 : index
    %c0_66 = arith.constant 0 : index
    %222 = vector.load %arg11[%c0_65, %c0_66] : memref<32x32xbf16, #tpu.memory_space<vmem>>, vector<32x32xbf16>
    %cst_67 = arith.constant dense<0.000000e+00> : vector<8x32xf32>
    %223 = tpu.matmul %221, %222, %cst_67 {dimension_numbers = #tpu.dot_dimension_numbers<[1], [0], [0], [1], [0, 0, 1, 1], [], []>} : vector<8x32xbf16>, vector<32x32xbf16>, vector<8x32xf32> -> vector<8x32xf32>
    %c0_68 = arith.constant 0 : index
    %c0_69 = arith.constant 0 : index
    %224 = vector.load %arg12[%c0_68, %c0_69] : memref<1x32xf32, #tpu.memory_space<vmem>>, vector<1x32xf32>
    %225 = vector.broadcast %224 : vector<1x32xf32> to vector<8x32xf32>
    %226 = arith.addf %223, %225 : vector<8x32xf32>
    %227 = arith.addf %6, %226 : vector<8x32xf32>
    %c0_70 = arith.constant 0 : index
    %c0_71 = arith.constant 0 : index
    %228 = vector.load %arg13[%c0_70, %c0_71] : memref<1x32xf32, #tpu.memory_space<vmem>>, vector<1x32xf32>
    %c0_72 = arith.constant 0 : index
    %c0_73 = arith.constant 0 : index
    %229 = vector.load %arg14[%c0_72, %c0_73] : memref<1x32xf32, #tpu.memory_space<vmem>>, vector<1x32xf32>
    %cst_74 = arith.constant dense<0.000000e+00> : vector<8xf32>
    %230 = vector.multi_reduction <add>, %227, %cst_74 [1] : vector<8x32xf32> to vector<8xf32>
    %231 = vector.shape_cast %230 : vector<8xf32> to vector<8x1xf32>
    %cst_75 = arith.constant 3.200000e+01 : f32
    %232 = vector.broadcast %cst_75 : f32 to vector<8x1xf32>
    %233 = arith.divf %231, %232 : vector<8x1xf32>
    %234 = vector.broadcast %233 : vector<8x1xf32> to vector<8x32xf32>
    %235 = arith.subf %227, %234 : vector<8x32xf32>
    %236 = arith.mulf %235, %235 : vector<8x32xf32>
    %cst_76 = arith.constant dense<0.000000e+00> : vector<8xf32>
    %237 = vector.multi_reduction <add>, %236, %cst_76 [1] : vector<8x32xf32> to vector<8xf32>
    %238 = vector.shape_cast %237 : vector<8xf32> to vector<8x1xf32>
    %cst_77 = arith.constant 3.200000e+01 : f32
    %239 = vector.broadcast %cst_77 : f32 to vector<8x1xf32>
    %240 = arith.divf %238, %239 : vector<8x1xf32>
    %cst_78 = arith.constant 9.99999974E-6 : f32
    %241 = vector.broadcast %cst_78 : f32 to vector<8x1xf32>
    %242 = arith.addf %240, %241 : vector<8x1xf32>
    %243 = math.rsqrt %242 : vector<8x1xf32>
    %244 = vector.broadcast %243 : vector<8x1xf32> to vector<8x32xf32>
    %245 = arith.mulf %235, %244 : vector<8x32xf32>
    %246 = vector.broadcast %228 : vector<1x32xf32> to vector<8x32xf32>
    %247 = arith.mulf %245, %246 : vector<8x32xf32>
    %248 = vector.broadcast %229 : vector<1x32xf32> to vector<8x32xf32>
    %249 = arith.addf %247, %248 : vector<8x32xf32>
    %250 = arith.truncf %249 : vector<8x32xf32> to vector<8x32xbf16>
    %c0_79 = arith.constant 0 : index
    %c0_80 = arith.constant 0 : index
    %251 = vector.load %arg15[%c0_79, %c0_80] : memref<32x128xbf16, #tpu.memory_space<vmem>>, vector<32x128xbf16>
    %cst_81 = arith.constant dense<0.000000e+00> : vector<8x128xf32>
    %252 = tpu.matmul %250, %251, %cst_81 {dimension_numbers = #tpu.dot_dimension_numbers<[1], [0], [0], [1], [0, 0, 1, 1], [], []>} : vector<8x32xbf16>, vector<32x128xbf16>, vector<8x128xf32> -> vector<8x128xf32>
    %c0_82 = arith.constant 0 : index
    %c0_83 = arith.constant 0 : index
    %253 = vector.load %arg16[%c0_82, %c0_83] : memref<1x128xf32, #tpu.memory_space<vmem>>, vector<1x128xf32>
    %254 = vector.broadcast %253 : vector<1x128xf32> to vector<8x128xf32>
    %255 = arith.addf %252, %254 : vector<8x128xf32>
    %cst_84 = arith.constant 5.000000e-01 : f32
    %256 = vector.broadcast %cst_84 : f32 to vector<8x128xf32>
    %257 = arith.mulf %256, %255 : vector<8x128xf32>
    %cst_85 = arith.constant 0.707106769 : f32
    %258 = vector.broadcast %cst_85 : f32 to vector<8x128xf32>
    %259 = arith.mulf %255, %258 : vector<8x128xf32>
    %cst_86 = arith.constant -4.000000e+00 : f32
    %cst_87 = arith.constant 4.000000e+00 : f32
    %260 = vector.broadcast %cst_86 : f32 to vector<8x128xf32>
    %261 = arith.maximumf %260, %259 : vector<8x128xf32>
    %262 = vector.broadcast %cst_87 : f32 to vector<8x128xf32>
    %263 = arith.minimumf %262, %261 : vector<8x128xf32>
    %264 = arith.mulf %263, %263 : vector<8x128xf32>
    %cst_88 = arith.constant -2.72614237E-10 : f32
    %265 = vector.broadcast %cst_88 : f32 to vector<8x128xf32>
    %266 = arith.mulf %265, %264 : vector<8x128xf32>
    %cst_89 = arith.constant 2.77068146E-8 : f32
    %267 = vector.broadcast %cst_89 : f32 to vector<8x128xf32>
    %268 = arith.addf %266, %267 : vector<8x128xf32>
    %269 = arith.mulf %268, %264 : vector<8x128xf32>
    %cst_90 = arith.constant -2.10102394E-6 : f32
    %270 = vector.broadcast %cst_90 : f32 to vector<8x128xf32>
    %271 = arith.addf %269, %270 : vector<8x128xf32>
    %272 = arith.mulf %271, %264 : vector<8x128xf32>
    %cst_91 = arith.constant -5.69250624E-5 : f32
    %273 = vector.broadcast %cst_91 : f32 to vector<8x128xf32>
    %274 = arith.addf %272, %273 : vector<8x128xf32>
    %275 = arith.mulf %274, %264 : vector<8x128xf32>
    %cst_92 = arith.constant -7.34990637E-4 : f32
    %276 = vector.broadcast %cst_92 : f32 to vector<8x128xf32>
    %277 = arith.addf %275, %276 : vector<8x128xf32>
    %278 = arith.mulf %277, %264 : vector<8x128xf32>
    %cst_93 = arith.constant -2.954600e-03 : f32
    %279 = vector.broadcast %cst_93 : f32 to vector<8x128xf32>
    %280 = arith.addf %278, %279 : vector<8x128xf32>
    %281 = arith.mulf %280, %264 : vector<8x128xf32>
    %cst_94 = arith.constant -0.0160960332 : f32
    %282 = vector.broadcast %cst_94 : f32 to vector<8x128xf32>
    %283 = arith.addf %281, %282 : vector<8x128xf32>
    %cst_95 = arith.constant -1.45660715E-5 : f32
    %284 = vector.broadcast %cst_95 : f32 to vector<8x128xf32>
    %285 = arith.mulf %284, %264 : vector<8x128xf32>
    %cst_96 = arith.constant -2.13374049E-4 : f32
    %286 = vector.broadcast %cst_96 : f32 to vector<8x128xf32>
    %287 = arith.addf %285, %286 : vector<8x128xf32>
    %288 = arith.mulf %287, %264 : vector<8x128xf32>
    %cst_97 = arith.constant -0.00168282702 : f32
    %289 = vector.broadcast %cst_97 : f32 to vector<8x128xf32>
    %290 = arith.addf %288, %289 : vector<8x128xf32>
    %291 = arith.mulf %290, %264 : vector<8x128xf32>
    %cst_98 = arith.constant -0.00737332925 : f32
    %292 = vector.broadcast %cst_98 : f32 to vector<8x128xf32>
    %293 = arith.addf %291, %292 : vector<8x128xf32>
    %294 = arith.mulf %293, %264 : vector<8x128xf32>
    %cst_99 = arith.constant -0.0142647391 : f32
    %295 = vector.broadcast %cst_99 : f32 to vector<8x128xf32>
    %296 = arith.addf %294, %295 : vector<8x128xf32>
    %297 = arith.mulf %263, %283 : vector<8x128xf32>
    %298 = arith.divf %297, %296 : vector<8x128xf32>
    %cst_100 = arith.constant 1.000000e+00 : f32
    %299 = vector.broadcast %cst_100 : f32 to vector<8x128xf32>
    %300 = arith.addf %299, %298 : vector<8x128xf32>
    %301 = arith.mulf %257, %300 : vector<8x128xf32>
    %302 = arith.truncf %301 : vector<8x128xf32> to vector<8x128xbf16>
    %c0_101 = arith.constant 0 : index
    %c0_102 = arith.constant 0 : index
    %303 = vector.load %arg17[%c0_101, %c0_102] : memref<128x32xbf16, #tpu.memory_space<vmem>>, vector<128x32xbf16>
    %cst_103 = arith.constant dense<0.000000e+00> : vector<8x32xf32>
    %304 = tpu.matmul %302, %303, %cst_103 {dimension_numbers = #tpu.dot_dimension_numbers<[1], [0], [0], [1], [0, 0, 1, 1], [], []>} : vector<8x128xbf16>, vector<128x32xbf16>, vector<8x32xf32> -> vector<8x32xf32>
    %c0_104 = arith.constant 0 : index
    %c0_105 = arith.constant 0 : index
    %305 = vector.load %arg18[%c0_104, %c0_105] : memref<1x32xf32, #tpu.memory_space<vmem>>, vector<1x32xf32>
    %306 = vector.broadcast %305 : vector<1x32xf32> to vector<8x32xf32>
    %307 = arith.addf %304, %306 : vector<8x32xf32>
    %308 = arith.addf %227, %307 : vector<8x32xf32>
    %c0_106 = arith.constant 0 : index
    %c0_107 = arith.constant 0 : index
    %c0_108 = arith.constant 0 : index
    %309 = vector.load %arg19[%c0_106, %c0_107, %c0_108] : memref<1x8x32xf32, #tpu.memory_space<vmem>>, vector<1x8x32xf32>
    %310 = vector.shape_cast %309 : vector<1x8x32xf32> to vector<8x32xf32>
    %311 = vector.shape_cast %308 : vector<8x32xf32> to vector<1x8x32xf32>
    tpu.vector_store %arg19[%c0_106, %c0_107, %c0_108], %311 {strides = array<i32>} : memref<1x8x32xf32, #tpu.memory_space<vmem>>, vector<1x8x32xf32>,
    return
  }
  func.func @transform_0(%arg0: i32, %arg1: i32) -> (i32, i32, i32) {
    %c0_i32 = arith.constant 0 : i32
    %c0_i32_0 = arith.constant 0 : i32
    %c0_i32_1 = arith.constant 0 : i32
    return %arg0, %c0_i32, %c0_i32_0 : i32, i32, i32
  }
  func.func @transform_1(%arg0: i32, %arg1: i32) -> (i32, i32) {
    %c0_i32 = arith.constant 0 : i32
    %c0_i32_0 = arith.constant 0 : i32
    %c0_i32_1 = arith.constant 0 : i32
    return %c0_i32, %c0_i32_0 : i32, i32
  }
  func.func @transform_2(%arg0: i32, %arg1: i32) -> (i32, i32) {
    %c0_i32 = arith.constant 0 : i32
    %c0_i32_0 = arith.constant 0 : i32
    %c0_i32_1 = arith.constant 0 : i32
    return %c0_i32, %c0_i32_0 : i32, i32
  }
  func.func @transform_3(%arg0: i32, %arg1: i32) -> (i32, i32) {
    %c0_i32 = arith.constant 0 : i32
    %c0_i32_0 = arith.constant 0 : i32
    %c0_i32_1 = arith.constant 0 : i32
    return %c0_i32, %c0_i32_0 : i32, i32
  }
  func.func @transform_4(%arg0: i32, %arg1: i32) -> (i32, i32) {
    %c0_i32 = arith.constant 0 : i32
    %c0_i32_0 = arith.constant 0 : i32
    %c0_i32_1 = arith.constant 0 : i32
    return %c0_i32, %c0_i32_0 : i32, i32
  }
  func.func @transform_5(%arg0: i32, %arg1: i32) -> (i32, i32) {
    %c0_i32 = arith.constant 0 : i32
    %c0_i32_0 = arith.constant 0 : i32
    %c0_i32_1 = arith.constant 0 : i32
    return %c0_i32, %c0_i32_0 : i32, i32
  }
  func.func @transform_6(%arg0: i32, %arg1: i32) -> (i32, i32) {
    %c0_i32 = arith.constant 0 : i32
    %c0_i32_0 = arith.constant 0 : i32
    %c0_i32_1 = arith.constant 0 : i32
    return %c0_i32, %c0_i32_0 : i32, i32
  }
  func.func @transform_7(%arg0: i32, %arg1: i32) -> (i32, i32) {
    %c0_i32 = arith.constant 0 : i32
    %c0_i32_0 = arith.constant 0 : i32
    %c0_i32_1 = arith.constant 0 : i32
    return %c0_i32, %c0_i32_0 : i32, i32
  }
  func.func @transform_8(%arg0: i32, %arg1: i32) -> (i32, i32) {
    %c0_i32 = arith.constant 0 : i32
    %c0_i32_0 = arith.constant 0 : i32
    %c0_i32_1 = arith.constant 0 : i32
    return %c0_i32, %c0_i32_0 : i32, i32
  }
  func.func @transform_9(%arg0: i32, %arg1: i32) -> (i32, i32) {
    %c0_i32 = arith.constant 0 : i32
    %c0_i32_0 = arith.constant 0 : i32
    %c0_i32_1 = arith.constant 0 : i32
    return %c0_i32, %c0_i32_0 : i32, i32
  }
  func.func @transform_10(%arg0: i32, %arg1: i32) -> (i32, i32) {
    %c0_i32 = arith.constant 0 : i32
    %c0_i32_0 = arith.constant 0 : i32
    %c0_i32_1 = arith.constant 0 : i32
    return %c0_i32, %c0_i32_0 : i32, i32
  }
  func.func @transform_11(%arg0: i32, %arg1: i32) -> (i32, i32) {
    %c0_i32 = arith.constant 0 : i32
    %c0_i32_0 = arith.constant 0 : i32
    %c0_i32_1 = arith.constant 0 : i32
    return %c0_i32, %c0_i32_0 : i32, i32
  }
  func.func @transform_12(%arg0: i32, %arg1: i32) -> (i32, i32) {
    %c0_i32 = arith.constant 0 : i32
    %c0_i32_0 = arith.constant 0 : i32
    %c0_i32_1 = arith.constant 0 : i32
    return %c0_i32, %c0_i32_0 : i32, i32
  }
  func.func @transform_13(%arg0: i32, %arg1: i32) -> (i32, i32) {
    %c0_i32 = arith.constant 0 : i32
    %c0_i32_0 = arith.constant 0 : i32
    %c0_i32_1 = arith.constant 0 : i32
    return %c0_i32, %c0_i32_0 : i32, i32
  }
  func.func @transform_14(%arg0: i32, %arg1: i32) -> (i32, i32) {
    %c0_i32 = arith.constant 0 : i32
    %c0_i32_0 = arith.constant 0 : i32
    %c0_i32_1 = arith.constant 0 : i32
    return %c0_i32, %c0_i32_0 : i32, i32
  }
  func.func @transform_15(%arg0: i32, %arg1: i32) -> (i32, i32) {
    %c0_i32 = arith.constant 0 : i32
    %c0_i32_0 = arith.constant 0 : i32
    %c0_i32_1 = arith.constant 0 : i32
    return %c0_i32, %c0_i32_0 : i32, i32
  }
  func.func @transform_16(%arg0: i32, %arg1: i32) -> (i32, i32) {
    %c0_i32 = arith.constant 0 : i32
    %c0_i32_0 = arith.constant 0 : i32
    %c0_i32_1 = arith.constant 0 : i32
    return %c0_i32, %c0_i32_0 : i32, i32
  }
  func.func @transform_17(%arg0: i32, %arg1: i32) -> (i32, i32, i32) {
    %c0_i32 = arith.constant 0 : i32
    %c0_i32_0 = arith.constant 0 : i32
    return %arg0, %arg1, %c0_i32 : i32, i32, i32
  }
}

</mosaic_0001>

<bundles_post_ra>
// kernel: tpu_custom_call.1
= control target key start
LH: loop header
LB: loop body
LE: loop exit
PB: predicated region body
PF: predicated region fallthrough
CT: control target
= control target key end

     0   :  { %s3403_s0 = inlined_call_operand.vmem [shape: f32[2,8,32], index: 0, kind: input, shape index: {}]   ;;  %s3404_s1 = inlined_call_operand.vmem [shape: f32[1,32], index: 1, kind: input, shape index: {}]   ;;  %s3405_s2 = inlined_call_operand.vmem [shape: f32[1,32], index: 2, kind: input, shape index: {}]   ;;  %s3406_s3 = inlined_call_operand.vmem [shape: bf16[32,32], index: 3, kind: input, shape index: {}]   ;;  %s3407_s4 = inlined_call_operand.hbm [shape: f32[1,32], index: 4, kind: input, shape index: {}]   ;;  %s3408_s5 = inlined_call_operand.vmem [shape: bf16[32,32], index: 5, kind: input, shape index: {}]   ;;  %s3409_s6 = inlined_call_operand.hbm [shape: f32[1,32], index: 6, kind: input, shape index: {}]   ;;  %s3410_s7 = inlined_call_operand.vmem [shape: bf16[32,32], index: 7, kind: input, shape index: {}]   ;;  %s3411_s8 = inlined_call_operand.hbm [shape: f32[1,32], index: 8, kind: input, shape index: {}]   ;;  %s3412_s9 = inlined_call_operand.vmem [shape: bf16[32,32], index: 9, kind: input, shape index: {}]   ;;  %s3413_s10 = inlined_call_operand.vmem [shape: f32[1,32], index: 10, kind: input, shape index: {}]   ;;  %s3414_s11 = inlined_call_operand.vmem [shape: f32[1,32], index: 11, kind: input, shape index: {}]   ;;  %s3415_s12 = inlined_call_operand.vmem [shape: f32[1,32], index: 12, kind: input, shape index: {}]   ;;  %s3416_s13 = inlined_call_operand.vmem [shape: bf16[32,128], index: 13, kind: input, shape index: {}]   ;;  %s3417_s14 = inlined_call_operand.vmem [shape: f32[1,128], index: 14, kind: input, shape index: {}]   ;;  %s3418_s15 = inlined_call_operand.vmem [shape: bf16[128,32], index: 15, kind: input, shape index: {}]   ;;  %s3419_s16 = inlined_call_operand.vmem [shape: f32[1,32], index: 16, kind: input, shape index: {}]   ;;  %s3420_s17 = inlined_call_operand.hbm [shape: f32[2,8,32], index: 17, kind: output, shape index: {}]  }
   0x1   :  { %3435 = sst [smem:[#allocation20_spill]] %s3403_s0 }
   0x2   :  { %3436 = sst [smem:[#allocation21_spill]] %s3404_s1 }
   0x3   :  { %3437 = sst [smem:[#allocation22_spill]] %s3409_s6 }
   0x4   :  { %3438 = sst [smem:[#allocation23_spill]] %s3419_s16 }
   0x5   :  { %3439 = sst [smem:[#allocation24_spill]] %s3420_s17 }
   0x6   :  { %22 = vsyncpa [#allocation3], 0 }
   0x7   :  { %23 = vsyncpa [#allocation6], 0 }
   0x8   :  { %24 = vsyncpa [#allocation4], 0 }
   0x9   :  { %26 = vsyncpa [#allocation4 + $0x1], 0  ;;  %s2913_s24 = smov 0   ;;  %s2915_s25 = smov 0  }
   0xa   :  { %s2917_s26 = smov 0   ;;  %s2919_s27 = smov 0  }
   0xb   :  { %s2921_s28 = smov 0   ;;  %s2923_s29 = smov 0  }
   0xc LB: > { %3440 = sst [smem:[#allocation12_spill]] %s2781_s24  ;;  %s2192_s0 = sadd.s32 4294967295, %s2801_s29   ;;  %s2801_s29 = sphi %s2923_s29, %s32_s29   ;;  %s2797_s28 = sphi %s2921_s28, %s3470_s28   ;;  %s2793_s27 = sphi %s2919_s27, %s3469_s27   ;;  %s2789_s26 = sphi %s2917_s26, %s3473_s26   ;;  %s2785_s25 = sphi %s2915_s25, %s3472_s25   ;;  %s2781_s24 = sphi %s2913_s24, %s3471_s24  }
   0xd   : > { %3441 = sst [smem:[#allocation13_spill]] %s2789_s26  ;;  %s2193_s30 = sadd.s32 4294967294, %s2801_s29  }
   0xe   : > { %3442 = sst [smem:[#allocation14_spill]] %s2797_s28  ;;  %s44_s18 = sadd.s32 1, %s2797_s28 }
   0xf   : > { %3443 = sst [smem:[#allocation15_spill]] %s2801_s29  ;;  %s415_s19 = sadd.s32 1, %s2789_s26 }
  0x10   : > { %p46_p0 = scmp.ge.s32.totalorder %s44_s18, 2  ;;  %p425_p1 = scmp.ne.s32.totalorder %s2789_s26, %s2785_s25 }
  0x11   : > { %p426_p2 = scmp.eq.s32.totalorder %s2192_s0, 1  ;;  %p431_p3 = scmp.ne.s32.totalorder %s2785_s25, %s2781_s24 }
  0x12   : > { %s3475_s18 = smov (%p46_p0, %s44_s18), 0  ;;  %p432_p5 = scmp.eq.s32.totalorder %s2193_s30, 1 }
  0x13   : > { %3444 = sst [smem:[#allocation16_spill]] %s3475_s18  ;;  %p2953_p4 = por %p426_p2, %p425_p1 }
  0x14   : > { %s410_s20 = ssub.s32 %s2797_s28, %s3475_s18  ;;  %p2194_p6 = scmp.ge.s32.totalorder %s2801_s29, 1 }
  0x15   : > { %s3445_s1 = scalar_select %p2953_p4, 1, 0 }
  0x16   : > { %p413_p7 = scmp.eq.s32.totalorder %s410_s20, 0  ;;  %p2960_p8 = por %p432_p5, %p431_p3 }
  0x17   : > { %3446 = sst [smem:[#allocation17_spill]] %s3445_s1  ;;  %p439_p9 = scmp.lt.s32.totalorder %s2801_s29, 3 }
  0x18   : > { %s3447_s21 = scalar_select %p2960_p8, 1, 0 }
  0x19   : > { %s2966_s22 = scalar_select %p413_p7, %s2789_s26, %s415_s19  }
  0x1a   : > { %3448 = sst [smem:[#allocation18_spill]] %s3447_s21  ;;  %p2968_p10 = pnand %p2194_p6, %p439_p9 }
  0x1b   : > { %3449 = sst [smem:[#allocation19_spill]] %s2966_s22  ;;  %p2972_p11 = scmp.eq.s32.totalorder %s2192_s0, 0 }
  0x1c   : > { %s3450_s23 = scalar_select %p2968_p10, 1, 0 }
  0x1d   : > { %s3451_s24 = scalar_select %p2972_p11, 1, 0 }
  0x1e   : > { %p2485_p12 = pneg %p2968_p10  ;;  %s2803_s30 = smov [#allocation5]  }
  0x1f   : > { %s475_s20 = sshll.u32 %s2803_s30, 4  ;;  %s2804_s19 = smov [#allocation2]   ;;  %s476_s20 = int_to_ptr.vmem [resolvable:$true] %s475_s20 }
  0x20   : > { %p2980_p13 = pnand %p2972_p11, %p2485_p12  ;;  %s461_s28 = sshll.u32 %s2804_s19, 4  ;;  %s2984_s28 = int_to_ptr.vmem [resolvable:$true] %s461_s28 }
  0x21   : > { %s3453_s6 = sld [smem:[#allocation22_spill]] }
  0x22   : > { %p2994_p1 = pneg %p2980_p13 }
  0x27   : > { %s2631_s26 = scalar_lea.hbm %s3453_s6, 16 }
  0x28   : > { %p2632_p0 = scmp.ne.s32.totalorder %s3453_s6, %s2631_s26  ;;  %p2638_p5 = scmp.lt.u32.totalorder %s2631_s26, %s3453_s6 }
  0x2a   : > { %p2634_p2 = pnand %p2994_p1, %p2632_p0 }
  0x2c   : > { %p2635_p3 = pneg %p2634_p2 }
  0x2e   : > { %p2640_p6 = pnand %p2638_p5, %p2635_p3 }
  0x30   : > { %2643 = shalt.err (!%p2640_p6)
}
  0x31   : > { %s2644_s22 = scalar_lea.vmem %s476_s20, 16  ;;  %s2651_s29 = scalar_lea.vmem %s476_s20, 32 }
  0x32   : > { %p2645_p7 = scmp.ne.s32.totalorder %s476_s20, %s2644_s22  ;;  %p2652_p8 = scmp.lt.s32.totalorder %s476_s20, %s476_s20 }
  0x33   : > { %p2653_p4 = scmp.lt.s32.totalorder %s2651_s29, %s2644_s22 }
  0x34   : > { %p2647_p9 = pnand %p2645_p7, %p2994_p1 }
  0x35   : > { %p2654_p11 = por %p2653_p4, %p2652_p8 }
  0x36   : > { %p2648_p12 = pneg %p2647_p9 }
  0x38   : > { %p2655_p10 = pnand %p2654_p11, %p2648_p12 }
  0x3a   : > { %2658 = shalt.err (!%p2655_p10)
}
  0x3b   : > { %2491 = dma.hbm_to_vmem [thread:$0]  (!%p2980_p13), %s3453_s6, 16, %s476_s20, [#allocation6]  }
  0x3c   : > { %s2659_s19 = scalar_lea.hbm %s3407_s4, 16 }
  0x3d   : > { %p2660_p0 = scmp.ne.s32.totalorder %s3407_s4, %s2659_s19  ;;  %p2666_p8 = scmp.lt.u32.totalorder %s2659_s19, %s3407_s4 }
  0x3f   : > { %p2662_p2 = pnand %p2660_p0, %p2994_p1 }
  0x41   : > { %p2663_p4 = pneg %p2662_p2 }
  0x43   : > { %p2668_p10 = pnand %p2666_p8, %p2663_p4 }
  0x45   : > { %2671 = shalt.err (!%p2668_p10)
}
  0x46   : > { %s2672_s20 = scalar_lea.vmem %s2984_s28, 16  ;;  %s2679_s16 = scalar_lea.vmem %s2984_s28, 32 }
  0x47   : > { %p2673_p11 = scmp.ne.s32.totalorder %s2984_s28, %s2672_s20  ;;  %p2680_p6 = scmp.lt.s32.totalorder %s2984_s28, %s2984_s28 }
  0x48   : > { %p2681_p7 = scmp.lt.s32.totalorder %s2679_s16, %s2672_s20 }
  0x49   : > { %p2675_p3 = pnand %p2673_p11, %p2994_p1 }
  0x4a   : > { %p2682_p9 = por %p2681_p7, %p2680_p6 }
  0x4b   : > { %p2676_p5 = pneg %p2675_p3 }
  0x4d   : > { %p2683_p12 = pnand %p2682_p9, %p2676_p5 }
  0x4f   : > { %2686 = shalt.err (!%p2683_p12)
}
  0x50   : > { %2488 = dma.hbm_to_vmem [thread:$0]  (!%p2980_p13), %s3407_s4, 16, %s2984_s28, [#allocation3]  }
  0x51   : > { %s2805_s0 = smov [#allocation7]   ;;  %s2687_s22 = scalar_lea.hbm %s3411_s8, 16 }
  0x52   : > { %s489_s17 = sshll.u32 %s2805_s0, 4  ;;  %p2688_p0 = scmp.ne.s32.totalorder %s3411_s8, %s2687_s22  ;;  %s490_s17 = int_to_ptr.vmem [resolvable:$true] %s489_s17 }
  0x53   : > { %p2694_p8 = scmp.lt.u32.totalorder %s2687_s22, %s3411_s8 }
  0x54   : > { %p2690_p2 = pnand %p2688_p0, %p2994_p1 }
  0x56   : > { %p2691_p4 = pneg %p2690_p2 }
  0x58   : > { %p2696_p10 = pnand %p2694_p8, %p2691_p4 }
  0x5a   : > { %2699 = shalt.err (!%p2696_p10)
}
  0x5b   : > { %s2700_s28 = scalar_lea.vmem %s490_s17, 16  ;;  %s2707_s1 = scalar_lea.vmem %s490_s17, 32 }
  0x5c   : > { %p2701_p11 = scmp.ne.s32.totalorder %s490_s17, %s2700_s28  ;;  %p2708_p6 = scmp.lt.s32.totalorder %s490_s17, %s490_s17 }
  0x5d   : > { %p2709_p7 = scmp.lt.s32.totalorder %s2707_s1, %s2700_s28 }
  0x5e   : > { %p2703_p3 = pnand %p2701_p11, %p2994_p1 }
  0x5f   : > { %p2710_p9 = por %p2709_p7, %p2708_p6 }
  0x60   : > { %p2704_p5 = pneg %p2703_p3 }
  0x62   : > { %p2711_p12 = pnand %p2710_p9, %p2704_p5 }
  0x64   : > { %2714 = shalt.err (!%p2711_p12)
}
  0x65   : > { %2494 = dma.hbm_to_vmem [thread:$0]  (!%p2980_p13), %s3411_s8, 16, %s490_s17, [#allocation6]  }
  0x66   : > { %p3455_p0 = scmp.ne.s32.totalorder %s3450_s23, 0 }
  0x67   : > { %p3456_p2 = scmp.ne.s32.totalorder (!%p3455_p0), %s3451_s24, 0 }
  0x68   : > { %533 = sbr.rel (%p3455_p0) target bundleno = 2749 (0xabd), region = 88 }
  0x6f   : > { %2768 = dma.done.wait (%p3456_p2), [#allocation3], 16  }
  0x70   : > { %2770 = vsyncadd (%p3456_p2), [#allocation3], 4294967280 }
  0x71   : > { %2772 = dma.done.wait (%p3456_p2), [#allocation6], 32  }
  0x72   : > { %2774 = vsyncadd (%p3456_p2), [#allocation6], 4294967264  ;;  %p592_p1 = scmp.lt.s32.totalorder %s2793_s27, 1  ;;  %s3457_s17 = sld [smem:[#allocation20_spill]]  ;;  %vm603_vm0 = vcmask 261120   ;;  %v2573_v12 = vld [vmem:[%s3408_s5] sm:$0xff]  }
  0x73   : > { %v2806_v13 = vmov 0.0   ;;  %v2574_v14 = vld [vmem:[%s3408_s5 + $0x8] sm:$0xff]   ;;  %vm2807_vm1 = vmmov 0   ;;  %s3458_s28 = sld [smem:[#allocation21_spill]]  ;;  %v2206_v24 = vld [vmem:[%s3405_s2] ss:$0 sm:$0xff] }
  0x74   : > { %s593_s6 = scalar_select %p592_p1, %s2793_s27, 1  ;;  %2315 = vmatprep.subr.bf16.mxu0 %v2806_v13  ;;  %2339 = vmatprep.subr.bf16.mxu1 %v2806_v13  ;;  %v2575_v27 = vld [vmem:[%s3410_s7] sm:$0xff]   ;;  %v2576_v30 = vld [vmem:[%s3410_s7 + $0x8] sm:$0xff]   ;;  %vm848_vm2 = vcmask 31744   ;;  %vm911_vm3 = vcmask 1043456   ;;  %vm895_vm4 = vcmask 64512  }
  0x75   : > { %2316 = vmatpush3.bf16.msra.mxu0 %v2573_v12  ;;  %2319 = vmatprep.mubr.msk.bf16.mxu0 %vm2807_vm1, %v2806_v13  ;;  %v2577_v32 = vld [vmem:[%s3406_s3] sm:$0xff]   ;;  %v2578_v34 = vld [vmem:[%s3406_s3 + $0x8] sm:$0xff]   ;;  %s2808_s19 = smov 124   ;;  %s2809_s22 = smov 116   ;;  %vm1758_vm5 = vcmask 97280   ;;  %vm1760_vm6 = vcmask 130048  }
  0x76   : > { %s2204_s18 = sshll.u32 %s593_s6, 3  ;;  %2317 = vmatprep.subr.bf16.mxu0 %v2806_v13  ;;  %2341 = vmatprep.mubr.msk.bf16.mxu1 %vm2807_vm1, %v2806_v13  ;;  %v2207_v37 = vld [vmem:[#allocation5] ss:$0 sm:$0xff]  ;;  %v2211_v45 = vld [vmem:[#allocation7] ss:$0 sm:$0xff]  ;;  %s2810_s29 = smov 112  }
  0x77   : > { %v2215_v53 = vld [vmem:[#allocation2] ss:$0 sm:$0xff]  ;;  %s2811_s20 = smov 108   ;;  %s2812_s16 = smov 104   ;;  %vm1762_vm7 = vcmask 162816   ;;  %vm1764_vm8 = vcmask 195584  }
  0x78   : > { %s595_s26 = scalar_lea.vmem %s3457_s17, %s2204_s18  ;;  %s2814_s1 = smov 120   ;;  %vm1766_vm9 = vcmask 228352  }
  0x79   : > { %v3067_v0 = vld [vmem:[%s595_s26] sm:$0xff]  ;;  %2318 = vmatpush3.bf16.msra.mxu0 %v2574_v14  ;;  %s2815_s21 = smov 4   ;;  %s2816_s0 = smov 8  }
  0x7a   : > { %v604_v1 = vsel %vm603_vm0, %v3067_v0, 0.0  ;;  %2323 = vmatprep.subr.bf16.mxu0 %v2806_v13  ;;  %v2205_v22 = vld [vmem:[%s3458_s28] ss:$0 sm:$0xff]  ;;  %s2813_s28 = smov 100   ;;  %s2817_s6 = smov 12  }
  0x7b   : > { %605 = vadd.xlane.f32.xlu0 %v604_v1  ;;  %s2818_s18 = smov 16   ;;  %s2819_s17 = smov 20  }
  0x7c   : > { %s589_s26 = sand.u32 1, %s2785_s25   ;;  %s2822_s23 = smov [#allocation8]  }
  0x7d   : > { %s2203_s24 = sshll.u32 %s589_s26, 3 }
  0x7f   : > { %634 = vadd.xlane.f32.xlu0 %v604_v1 }
 0x108   : > { %v606_v2 = vpop.xlane.xlu0 %605 }
 0x109   : > { %v608_v3 = vmul.f32 0.03125, %v606_v2 }
 0x10b   : > { %v609_v4 = vsub.f32 %v3067_v0, %v608_v3 }
 0x10c   : > { %v635_v5 = vpop.xlane.xlu0 %634 }
 0x10d   : > { %v636_v6 = vmul.f32 0.03125, %v635_v5  ;;  %v610_v7 = vmul.f32 %v609_v4, %v609_v4 }
 0x10f   : > { %v637_v8 = vsub.f32 %v3067_v0, %v636_v6  ;;  %v611_v9 = vsel %vm603_vm0, %v610_v7, 0.0 }
 0x110   : > { %612 = vadd.xlane.f32.xlu1 %v611_v9 }
 0x111   : > { %v638_v10 = vmul.f32 %v637_v8, %v637_v8 }
 0x113   : > { %v639_v11 = vsel %vm603_vm0, %v638_v10, 0.0 }
 0x114   : > { %640 = vadd.xlane.f32.xlu1 %v639_v11 }
 0x19d   : > { %v613_v15 = vpop.xlane.xlu1 %612 }
 0x19e   : > { %v614_v16 = vmul.f32 0.03125, %v613_v15 }
 0x1a0   : > { %v615_v17 = vadd.f32 1e-05, %v614_v16 }
 0x1a1   : > { %v641_v18 = vpop.xlane.xlu1 %640 }
 0x1a2   : > { %2591 = vrsqrt.f32 %v615_v17  ;;  %v642_v19 = vmul.f32 0.03125, %v641_v18 }
 0x1a4   : > { %v643_v20 = vadd.f32 1e-05, %v642_v19 }
 0x1a6   : > { %2593 = vrsqrt.f32 %v643_v20 }
 0x1ac   : > { %v2592_v21 = vpop.eup %2591 }
 0x1ad   : > { %v617_v23 = vmul.f32 %v2592_v21, %v609_v4 }
 0x1af   : > { %v624_v25 = vmul.f32 %v2205_v22, %v617_v23 }
 0x1b0   : > { %v2594_v29 = vpop.eup %2593 }
 0x1b1   : > { %v631_v26 = vadd.f32 %v2206_v24, %v624_v25  ;;  %v645_v31 = vmul.f32 %v2594_v29, %v637_v8 }
 0x1b3   : > { %v632_v28 = vpack.c.bf16 %v631_v26, %v631_v26  ;;  %v646_v33 = vmul.f32 %v2205_v22, %v645_v31 }
 0x1b5   : > { %2320 = vmatmul.mubr.msk.bf16.vlgmr.msra.gmra.mrb[0].mxu0 %vm603_vm0, %v632_v28  ;;  %v647_v35 = vadd.f32 %v2206_v24, %v646_v33 }
 0x1b6   : > { %2324 = vmatpush3.bf16.msra.mxu0 %v2575_v27  ;;  %2327 = vmatprep.mubr.msk.bf16.mxu0 %vm2807_vm1, %v2806_v13 }
 0x1b7   : > { %2325 = vmatprep.subr.bf16.mxu0 %v2806_v13  ;;  %v648_v36 = vpack.c.bf16 %v647_v35, %v647_v35 }
 0x1ba   : > { %2326 = vmatpush3.bf16.msra.mxu0 %v2576_v30 }
 0x1bb   : > { %2331 = vmatprep.subr.bf16.mxu0 %v2806_v13 }
 0x1bd   : > { %2328 = vmatmul.mubr.msk.bf16.vlgmr.msra.gmra.mrb[4].mxu0 %vm603_vm0, %v632_v28 }
 0x1be   : > { %2332 = vmatpush3.bf16.msra.mxu0 %v2577_v32  ;;  %2335 = vmatprep.mubr.msk.bf16.mxu0 %vm2807_vm1, %v2806_v13 }
 0x1bf   : > { %2333 = vmatprep.subr.bf16.mxu0 %v2806_v13 }
 0x1c2   : > { %2334 = vmatpush3.bf16.msra.mxu0 %v2578_v34 }
 0x1c3   : > { %2345 = vmatprep.subr.bf16.mxu0 %v2806_v13 }
 0x1c5   : > { %2336 = vmatmul.mubr.msk.bf16.vlgmr.msra.gmra.mrb[8].mxu0 %vm603_vm0, %v648_v36 }
 0x1c6   : > { %2347 = vmatprep.mubr.msk.bf16.mxu0 %vm2807_vm1, %v2806_v13 }
 0x288   : > { %v709_v38 = vpop.f32.mrb[0].mxu0 }
 0x289   : > { %v710_v39 = vadd.f32 %v2207_v37, %v709_v38  ;;  %v2321_v40 = vpop.f32.mrb[1].mxu0 }
 0x28a   : > { %v712_v41 = vpop.f32.mrb[2].mxu0 }
 0x28b   : > { %v846_v42 = vpack.c.bf16 %v710_v39, %v710_v39  ;;  %v2322_v43 = vpop.f32.mrb[3].mxu0 }
 0x28d   : > { %959 = vrot.lane.b32.xlu0 %v846_v42, %s2808_s19  ;;  %v853_v44 = vsel %vm848_vm2, %v846_v42, 0 }
 0x28e   : > { %2340 = vmatpush3.bf16.xpose.msra.mxu1 %v853_v44 }
 0x28f   : > { %2351 = vmatprep.subr.bf16.mxu1 %v2806_v13 }
 0x290   : > { %v772_v46 = vpop.f32.mrb[4].mxu0 }
 0x291   : > { %v773_v47 = vadd.f32 %v2211_v45, %v772_v46  ;;  %1180 = vrot.lane.b32.xlu0 %v846_v42, %s2809_s22  ;;  %v2329_v48 = vpop.f32.mrb[5].mxu0 }
 0x292   : > { %v775_v49 = vpop.f32.mrb[6].mxu0 }
 0x293   : > { %v3124_v50 = vpack.c.bf16 %v773_v47, %v773_v47  ;;  %v2330_v51 = vpop.f32.mrb[7].mxu0 }
 0x295   : > { %1290 = vrot.lane.b32.xlu0 %v846_v42, %s2810_s29  ;;  %v913_v52 = vsel %vm911_vm3, %v3124_v50, 0 }
 0x296   : > { %2346 = vmatpush3.bf16.msra.mxu0 %v913_v52 }
 0x297   : > { %2357 = vmatprep.subr.bf16.mxu0 %v2806_v13 }
 0x298   : > { %v838_v54 = vpop.f32.mrb[8].mxu0 }
 0x299   : > { %v839_v55 = vadd.f32 %v2215_v53, %v838_v54  ;;  %1400 = vrot.lane.b32.xlu0 %v846_v42, %s2811_s20  ;;  %v2337_v56 = vpop.f32.mrb[9].mxu0 }
 0x29a   : > { %v841_v57 = vpop.f32.mrb[10].mxu0 }
 0x29b   : > { %v844_v58 = vmul.f32 0.5, %v839_v55  ;;  %v2338_v59 = vpop.f32.mrb[11].mxu0 }
 0x29d   : > { %v845_v60 = vpack.c.bf16 %v844_v58, %v844_v58  ;;  %1510 = vrot.lane.b32.xlu0 %v846_v42, %s2812_s16 }
 0x29f   : > { %956 = vrot.lane.b32.xlu1 %v845_v60, %s2808_s19  ;;  %2342 = vmatmul.mubr.msk.bf16.vlgmr.msra.gmra.mrb[0].mxu1 %vm848_vm2, %v845_v60 }
 0x2a0   : > { %2353 = vmatprep.mubr.msk.bf16.mxu1 %vm2807_vm1, %v2806_v13 }
 0x2a1   : > { %1620 = vrot.lane.b32.xlu0 %v846_v42, %s2813_s28 }
 0x2a3   : > { %1070 = vrot.lane.b32.xlu1 %v846_v42, %s2814_s1 }
 0x2a7   : > { %1068 = vrot.lane.b32.xlu1 %v845_v60, %s2814_s1 }
 0x2ab   : > { %1178 = vrot.lane.b32.xlu1 %v845_v60, %s2809_s22 }
 0x2af   : > { %1288 = vrot.lane.b32.xlu1 %v845_v60, %s2810_s29 }
 0x2b3   : > { %1398 = vrot.lane.b32.xlu1 %v845_v60, %s2811_s20 }
 0x2b7   : > { %1508 = vrot.lane.b32.xlu1 %v845_v60, %s2812_s16 }
 0x2bb   : > { %1618 = vrot.lane.b32.xlu1 %v845_v60, %s2813_s28 }
 0x2ff   : > { %v960_v61 = vpop.permute.xlu0 %959 }
 0x300   : > { %v965_v62 = vsel %vm848_vm2, %v960_v61, 0 }
 0x301   : > { %2352 = vmatpush3.bf16.xpose.msra.mxu1 %v965_v62 }
 0x302   : > { %2363 = vmatprep.subr.bf16.mxu1 %v2806_v13 }
 0x303   : > { %v1181_v3 = vpop.permute.xlu0 %1180 }
 0x304   : > { %v1186_v5 = vsel %vm848_vm2, %v1181_v3, 0 }
 0x307   : > { %v1291_v6 = vpop.permute.xlu0 %1290 }
 0x308   : > { %v1296_v8 = vsel %vm848_vm2, %v1291_v6, 0 }
 0x30b   : > { %v1401_v9 = vpop.permute.xlu0 %1400 }
 0x30c   : > { %v1406_v11 = vsel %vm848_vm2, %v1401_v9, 0 }
 0x30f   : > { %v1511_v12 = vpop.permute.xlu0 %1510 }
 0x310   : > { %v1516_v15 = vsel %vm848_vm2, %v1511_v12, 0 }
 0x311   : > { %v957_v63 = vpop.permute.xlu1 %956 }
 0x312   : > { %2354 = vmatmul.mubr.msk.bf16.vlgmr.msra.gmra.mrb[4].mxu1 %vm848_vm2, %v957_v63 }
 0x313   : > { %2365 = vmatprep.mubr.msk.bf16.mxu1 %vm2807_vm1, %v2806_v13  ;;  %v1621_v16 = vpop.permute.xlu0 %1620 }
 0x314   : > { %v1626_v18 = vsel %vm848_vm2, %v1621_v16, 0 }
 0x315   : > { %v1071_v1 = vpop.permute.xlu1 %1070 }
 0x316   : > { %v1076_v2 = vsel %vm848_vm2, %v1071_v1, 0 }
 0x317   : > { %2364 = vmatpush3.bf16.xpose.msra.mxu1 %v1076_v2 }
 0x318   : > { %2375 = vmatprep.subr.bf16.mxu1 %v2806_v13 }
 0x319   : > { %v1069_v4 = vpop.permute.xlu1 %1068 }
 0x31d   : > { %v1179_v7 = vpop.permute.xlu1 %1178 }
 0x31e   : > { %2366 = vmatmul.mubr.msk.bf16.vlgmr.msra.gmra.mrb[8].mxu1 %vm848_vm2, %v1069_v4 }
 0x31f   : > { %2376 = vmatpush3.bf16.xpose.msra.mxu1 %v1186_v5  ;;  %2377 = vmatprep.mubr.msk.bf16.mxu1 %vm2807_vm1, %v2806_v13 }
 0x320   : > { %2387 = vmatprep.subr.bf16.mxu1 %v2806_v13 }
 0x321   : > { %v1289_v10 = vpop.permute.xlu1 %1288 }
 0x325   : > { %v1399_v14 = vpop.permute.xlu1 %1398 }
 0x326   : > { %2378 = vmatmul.mubr.msk.bf16.vlgmr.msra.gmra.mrb[12].mxu1 %vm848_vm2, %v1179_v7 }
 0x327   : > { %2388 = vmatpush3.bf16.xpose.msra.mxu1 %v1296_v8  ;;  %2389 = vmatprep.mubr.msk.bf16.mxu1 %vm2807_vm1, %v2806_v13 }
 0x328   : > { %2399 = vmatprep.subr.bf16.mxu1 %v2806_v13 }
 0x329   : > { %v1509_v17 = vpop.permute.xlu1 %1508 }
 0x32d   : > { %v1619_v19 = vpop.permute.xlu1 %1618 }
 0x32e   : > { %2390 = vmatmul.mubr.msk.bf16.vlgmr.msra.gmra.mrb[16].mxu1 %vm848_vm2, %v1289_v10 }
 0x32f   : > { %2400 = vmatpush3.bf16.xpose.msra.mxu1 %v1406_v11  ;;  %2401 = vmatprep.mubr.msk.bf16.mxu1 %vm2807_vm1, %v2806_v13 }
 0x330   : > { %2411 = vmatprep.subr.bf16.mxu1 %v2806_v13 }
 0x336   : > { %2402 = vmatmul.mubr.msk.bf16.vlgmr.msra.gmra.mrb[20].mxu1 %vm848_vm2, %v1399_v14 }
 0x337   : > { %2412 = vmatpush3.bf16.xpose.msra.mxu1 %v1516_v15  ;;  %2413 = vmatprep.mubr.msk.bf16.mxu1 %vm2807_vm1, %v2806_v13 }
 0x338   : > { %2423 = vmatprep.subr.bf16.mxu1 %v2806_v13 }
 0x33e   : > { %2414 = vmatmul.mubr.msk.bf16.vlgmr.msra.gmra.mrb[24].mxu1 %vm848_vm2, %v1509_v17 }
 0x33f   : > { %2424 = vmatpush3.bf16.xpose.msra.mxu1 %v1626_v18  ;;  %2425 = vmatprep.mubr.msk.bf16.mxu1 %vm2807_vm1, %v2806_v13 }
 0x340   : > { %2435 = vmatprep.subr.bf16.mxu1 %v2806_v13 }
 0x346   : > { %2426 = vmatmul.mubr.msk.bf16.vlgmr.msra.gmra.mrb[28].mxu1 %vm848_vm2, %v1619_v19 }
 0x347   : > { %2439 = vmatprep.mubr.msk.bf16.mxu1 %vm2807_vm1, %v2806_v13 }
 0x372   : > { %v889_v20 = vpop.f32.mrb[0].mxu1 }
 0x373   : > { %v2343_v21 = vpop.f32.mrb[1].mxu1  ;;  %v896_v22 = vsel %vm895_vm4, %v889_v20, -inf }
 0x374   : > { %897 = vmax.xlane.f32.xlu0 %v896_v22  ;;  %v892_v23 = vpop.f32.mrb[2].mxu1 }
 0x375   : > { %v2344_v24 = vpop.f32.mrb[3].mxu1 }
 0x3e5   : > { %v1001_v25 = vpop.f32.mrb[4].mxu1 }
 0x3e6   : > { %v2355_v26 = vpop.f32.mrb[5].mxu1  ;;  %v1007_v27 = vsel %vm895_vm4, %v1001_v25, -inf }
 0x3e7   : > { %1008 = vmax.xlane.f32.xlu1 %v1007_v27  ;;  %v1004_v28 = vpop.f32.mrb[6].mxu1 }
 0x3e8   : > { %v2356_v29 = vpop.f32.mrb[7].mxu1 }
 0x3f1   : > { %v1112_v30 = vpop.f32.mrb[8].mxu1 }
 0x3f2   : > { %v2367_v31 = vpop.f32.mrb[9].mxu1  ;;  %v1118_v32 = vsel %vm895_vm4, %v1112_v30, -inf }
 0x3f3   : > { %1119 = vmax.xlane.f32.xlu0 %v1118_v32  ;;  %v1115_v33 = vpop.f32.mrb[10].mxu1 }
 0x3f4   : > { %v2368_v34 = vpop.f32.mrb[11].mxu1 }
 0x3f9   : > { %v1222_v35 = vpop.f32.mrb[12].mxu1 }
 0x3fa   : > { %v2379_v36 = vpop.f32.mrb[13].mxu1  ;;  %v1228_v37 = vsel %vm895_vm4, %v1222_v35, -inf }
 0x3fb   : > { %1229 = vmax.xlane.f32.xlu0 %v1228_v37  ;;  %v1225_v38 = vpop.f32.mrb[14].mxu1 }
 0x3fc   : > { %v2380_v39 = vpop.f32.mrb[15].mxu1 }
 0x401   : > { %v3183_v40 = vpop.f32.mrb[16].mxu1  ;;  %v898_v41 = vpop.xlane.xlu0 %897 }
 0x402   : > { %v899_v42 = vsub.f32 %v889_v20, %v898_v41  ;;  %v2391_v43 = vpop.f32.mrb[17].mxu1  ;;  %v1338_v44 = vsel %vm895_vm4, %v3183_v40, -inf }
 0x403   : > { %1339 = vmax.xlane.f32.xlu0 %v1338_v44  ;;  %v1335_v45 = vpop.f32.mrb[18].mxu1 }
 0x404   : > { %v2392_v46 = vpop.f32.mrb[19].mxu1  ;;  %v900_v47 = vmul.f32 1.442695, %v899_v42 }
 0x406   : > { %2595 = vpow2.f32 %v900_v47 }
 0x409   : > { %v3187_v48 = vpop.f32.mrb[20].mxu1 }
 0x40a   : > { %v2403_v49 = vpop.f32.mrb[21].mxu1  ;;  %v1448_v51 = vsel %vm895_vm4, %v3187_v48, -inf }
 0x40b   : > { %1449 = vmax.xlane.f32.xlu1 %v1448_v51  ;;  %v1445_v52 = vpop.f32.mrb[22].mxu1 }
 0x40c   : > { %v2404_v53 = vpop.f32.mrb[23].mxu1 }
 0x410   : > { %v2596_v57 = vpop.eup %2595 }
 0x411   : > { %v1552_v54 = vpop.f32.mrb[24].mxu1  ;;  %v902_v60 = vsel %vm895_vm4, %v2596_v57, 0.0 }
 0x412   : > { %v2415_v55 = vpop.f32.mrb[25].mxu1  ;;  %v1558_v56 = vsel %vm895_vm4, %v1552_v54, -inf }
 0x413   : > { %1559 = vmax.xlane.f32.xlu0 %v1558_v56  ;;  %v1555_v58 = vpop.f32.mrb[26].mxu1 }
 0x414   : > { %v2416_v59 = vpop.f32.mrb[27].mxu1 }
 0x417   : > { %903 = vadd.xlane.f32.xlu0 %v902_v60 }
 0x419   : > { %v1662_v61 = vpop.f32.mrb[28].mxu1 }
 0x41a   : > { %v2427_v62 = vpop.f32.mrb[29].mxu1  ;;  %v1668_v63 = vsel %vm895_vm4, %v1662_v61, -inf }
 0x41b   : > { %1669 = vmax.xlane.f32.xlu1 %v1668_v63  ;;  %v1665_v1 = vpop.f32.mrb[30].mxu1 }
 0x41c   : > { %v2428_v2 = vpop.f32.mrb[31].mxu1 }
 0x42c   : > { %1020 = vrot.lane.b32.xlu1 %v3124_v50, %s2808_s19  ;;  %s2820_s19 = smov 24  }
 0x42d   : > { %1130 = vrot.lane.b32.xlu0 %v3124_v50, %s2814_s1 }
 0x474   : > { %v1009_v3 = vpop.xlane.xlu1 %1008 }
 0x475   : > { %v1010_v4 = vsub.f32 %v1001_v25, %v1009_v3 }
 0x477   : > { %v1011_v5 = vmul.f32 1.442695, %v1010_v4 }
 0x479   : > { %2597 = vpow2.f32 %v1011_v5 }
 0x480   : > { %v1120_v6 = vpop.xlane.xlu0 %1119 }
 0x481   : > { %v1121_v7 = vsub.f32 %v1112_v30, %v1120_v6 }
 0x483   : > { %v3198_v8 = vpop.eup %2597  ;;  %v1122_v9 = vmul.f32 1.442695, %v1121_v7 }
 0x484   : > { %v1013_v10 = vsel %vm895_vm4, %v3198_v8, 0.0 }
 0x485   : > { %2599 = vpow2.f32 %v1122_v9  ;;  %1014 = vadd.xlane.f32.xlu1 %v1013_v10 }
 0x488   : > { %v1230_v11 = vpop.xlane.xlu0 %1229 }
 0x489   : > { %v1231_v12 = vsub.f32 %v1222_v35, %v1230_v11 }
 0x48b   : > { %v1232_v14 = vmul.f32 1.442695, %v1231_v12 }
 0x48d   : > { %2601 = vpow2.f32 %v1232_v14 }
 0x48f   : > { %v3202_v15 = vpop.eup %2599 }
 0x490   : > { %v1124_v16 = vsel %vm895_vm4, %v3202_v15, 0.0  ;;  %v1340_v19 = vpop.xlane.xlu0 %1339 }
 0x491   : > { %1125 = vadd.xlane.f32.xlu0 %v1124_v16  ;;  %v1341_v25 = vsub.f32 %v3183_v40, %v1340_v19 }
 0x493   : > { %v1342_v29 = vmul.f32 1.442695, %v1341_v25 }
 0x497   : > { %v3206_v17 = vpop.eup %2601 }
 0x498   : > { %v1234_v18 = vsel %vm895_vm4, %v3206_v17, 0.0  ;;  %v1450_v22 = vpop.xlane.xlu1 %1449 }
 0x499   : > { %1235 = vadd.xlane.f32.xlu1 %v1234_v18  ;;  %v1451_v30 = vsub.f32 %v3187_v48, %v1450_v22 }
 0x49b   : > { %v1452_v33 = vmul.f32 1.442695, %v1451_v30 }
 0x4a0   : > { %v1560_v20 = vpop.xlane.xlu0 %1559 }
 0x4a1   : > { %v1561_v32 = vsub.f32 %v1552_v54, %v1560_v20 }
 0x4a3   : > { %v1562_v35 = vmul.f32 1.442695, %v1561_v32 }
 0x4a4   : > { %v904_v21 = vpop.xlane.xlu0 %903 }
 0x4a5   : > { %2603 = vrcp.f32 %v904_v21 }
 0x4a6   : > { %2605 = vpow2.f32 %v1342_v29 }
 0x4a7   : > { %1240 = vrot.lane.b32.xlu0 %v3124_v50, %s2809_s22  ;;  %2607 = vpow2.f32 %v1452_v33  ;;  %s2821_s22 = smov 28  }
 0x4a8   : > { %v1670_v23 = vpop.xlane.xlu1 %1669  ;;  %2609 = vpow2.f32 %v1562_v35  ;;  %v1131_v46 = vpop.permute.xlu0 %1130 }
 0x4a9   : > { %v1671_v34 = vsub.f32 %v1662_v61, %v1670_v23  ;;  %v1136_v52 = vsel %vm911_vm3, %v1131_v46, 0 }
 0x4aa   : > { %1350 = vrot.lane.b32.xlu1 %v3124_v50, %s2810_s29  ;;  %s3459_s29 = sld [smem:[#allocation23_spill]] }
 0x4ab   : > { %v1672_v36 = vmul.f32 1.442695, %v1671_v34 }
 0x4ac   : > { %v1021_v27 = vpop.permute.xlu1 %1020 }
 0x4ad   : > { %v1026_v31 = vsel %vm911_vm3, %v1021_v27, 0  ;;  %2611 = vpow2.f32 %v1672_v36 }
 0x4af   : > { %v2604_v24 = vpop.eup %2603 }
 0x4b0   : > { %v906_v26 = vmul.f32 %v2604_v24, %v2596_v57  ;;  %v2606_v37 = vpop.eup %2605 }
 0x4b1   : > { %v1344_v38 = vsel %vm895_vm4, %v2606_v37, 0.0  ;;  %v2608_v39 = vpop.eup %2607 }
 0x4b2   : > { %v907_v28 = vpack.c.bf16 %v906_v26, %v906_v26  ;;  %v3222_v40 = vpop.eup %2609  ;;  %v1454_v41 = vsel %vm895_vm4, %v2608_v39, 0.0 }
 0x4b3   : > { %v1564_v44 = vsel %vm895_vm4, %v3222_v40, 0.0 }
 0x4b4   : > { %2348 = vmatmul.mubr.msk.bf16.vlgmr.msra.gmra.mrb[12].mxu0 %vm895_vm4, %v907_v28 }
 0x4b5   : > { %2358 = vmatpush3.bf16.msra.mxu0 %v1026_v31  ;;  %2359 = vmatprep.mubr.msk.bf16.mxu0 %vm2807_vm1, %v2806_v13 }
 0x4b6   : > { %2369 = vmatprep.subr.bf16.mxu0 %v2806_v13 }
 0x4b7   : > { %v3225_v42 = vpop.eup %2611 }
 0x4b8   : > { %v1674_v43 = vsel %vm895_vm4, %v3225_v42, 0.0 }
 0x4c6   : > { %1345 = vadd.xlane.f32.xlu0 %v1344_v38 }
 0x4ca   : > { %1455 = vadd.xlane.f32.xlu0 %v1454_v41 }
 0x4ce   : > { %1675 = vadd.xlane.f32.xlu0 %v1674_v43  ;;  %1565 = vadd.xlane.f32.xlu1 %v1564_v44  ;;  %v2579_v43 = vld [vmem:[%s3412_s9] sm:$0xff]  }
 0x4cf   : > { %2436 = vmatpush3.bf16.msra.mxu1 %v2579_v43 }
 0x4d0   : > { %2437 = vmatprep.subr.bf16.mxu1 %v2806_v13 }
 0x4df   : > { %1570 = vrot.lane.b32.xlu1 %v3124_v50, %s2812_s16  ;;  %s2256_s16 = sshll.u32 %s2793_s27, 7  ;;  %s2077_s27 = scalar_lea.sflag [#allocation4], %s589_s26 }
 0x4e3   : > { %1680 = vrot.lane.b32.xlu1 %v3124_v50, %s2813_s28  ;;  %s591_s28 = scalar_lea.vmem [#allocation8], %s2203_s24 }
 0x4e4   : > { %1460 = vrot.lane.b32.xlu0 %v3124_v50, %s2811_s20  ;;  %s3460_s20 = sld [smem:[#allocation17_spill]]  ;;  %s2091_s1 = sshll.u32 %s591_s28, 4  ;;  %s3357_s1 = int_to_ptr.vmem [resolvable:$true] %s2091_s1 }
 0x4e5   : > { %s2715_s30 = scalar_lea.vmem %s3357_s1, 128 }
 0x4e6   : > { %p2716_p13 = scmp.ne.s32.totalorder %s3357_s1, %s2715_s30 }
 0x4ea   : > { %p3462_p4 = scmp.ne.s32.totalorder %s3460_s20, 0 }
 0x4ec   : > { %p2717_p8 = pnand %p2716_p13, %p3462_p4 }
 0x4ee   : > { %p2718_p10 = pneg %p2717_p8 }
 0x512   : > { %v1015_v45 = vpop.xlane.xlu1 %1014 }
 0x513   : > { %2613 = vrcp.f32 %v1015_v45 }
 0x51d   : > { %v2614_v47 = vpop.eup %2613 }
 0x51e   : > { %v1017_v48 = vmul.f32 %v2614_v47, %v3198_v8  ;;  %v1126_v49 = vpop.xlane.xlu0 %1125 }
 0x51f   : > { %2615 = vrcp.f32 %v1126_v49 }
 0x520   : > { %v1018_v51 = vpack.c.bf16 %v1017_v48, %v1017_v48  ;;  %v2580_v48 = vld [vmem:[%s3412_s9 + $0x8] sm:$0xff]  }
 0x521   : > { %2438 = vmatpush3.bf16.msra.mxu1 %v2580_v48 }
 0x522   : > { %2360 = vmatmul.mubr.msk.bf16.vlgmr.msra.gmra.mrb[16].mxu0 %vm895_vm4, %v1018_v51  ;;  %v1241_v55 = vpop.permute.xlu0 %1240  ;;  %2451 = vmatprep.subr.bf16.mxu1 %v2806_v13 }
 0x523   : > { %2370 = vmatpush3.bf16.msra.mxu0 %v1136_v52  ;;  %2371 = vmatprep.mubr.msk.bf16.mxu0 %vm2807_vm1, %v2806_v13  ;;  %v1246_v57 = vsel %vm911_vm3, %v1241_v55, 0 }
 0x524   : > { %2381 = vmatprep.subr.bf16.mxu0 %v2806_v13 }
 0x526   : > { %v1236_v50 = vpop.xlane.xlu1 %1235 }
 0x527   : > { %2617 = vrcp.f32 %v1236_v50 }
 0x529   : > { %v2616_v53 = vpop.eup %2615 }
 0x52a   : > { %v1128_v54 = vmul.f32 %v2616_v53, %v3202_v15  ;;  %v1351_v60 = vpop.permute.xlu1 %1350 }
 0x52b   : > { %v1356_v62 = vsel %vm911_vm3, %v1351_v60, 0 }
 0x52c   : > { %v1129_v56 = vpack.c.bf16 %v1128_v54, %v1128_v54 }
 0x52e   : > { %2372 = vmatmul.mubr.msk.bf16.vlgmr.msra.gmra.mrb[20].mxu0 %vm895_vm4, %v1129_v56 }
 0x52f   : > { %2382 = vmatpush3.bf16.msra.mxu0 %v1246_v57  ;;  %2383 = vmatprep.mubr.msk.bf16.mxu0 %vm2807_vm1, %v2806_v13 }
 0x530   : > { %2393 = vmatprep.subr.bf16.mxu0 %v2806_v13 }
 0x531   : > { %v2618_v58 = vpop.eup %2617 }
 0x532   : > { %v1238_v59 = vmul.f32 %v2618_v58, %v3206_v17 }
 0x534   : > { %v1239_v61 = vpack.c.bf16 %v1238_v59, %v1238_v59 }
 0x536   : > { %2384 = vmatmul.mubr.msk.bf16.vlgmr.msra.gmra.mrb[24].mxu0 %vm895_vm4, %v1239_v61 }
 0x537   : > { %2394 = vmatpush3.bf16.msra.mxu0 %v1356_v62  ;;  %2395 = vmatprep.mubr.msk.bf16.mxu0 %vm2807_vm1, %v2806_v13 }
 0x538   : > { %2405 = vmatprep.subr.bf16.mxu0 %v2806_v13 }
 0x553   : > { %v1346_v63 = vpop.xlane.xlu0 %1345 }
 0x554   : > { %2619 = vrcp.f32 %v1346_v63 }
 0x557   : > { %v1456_v1 = vpop.xlane.xlu0 %1455 }
 0x558   : > { %2621 = vrcp.f32 %v1456_v1 }
 0x55b   : > { %v1676_v2 = vpop.xlane.xlu0 %1675  ;;  %v1566_v3 = vpop.xlane.xlu1 %1565 }
 0x55c   : > { %2623 = vrcp.f32 %v1566_v3 }
 0x55d   : > { %2625 = vrcp.f32 %v1676_v2 }
 0x55e   : > { %v2620_v4 = vpop.eup %2619 }
 0x55f   : > { %v1348_v5 = vmul.f32 %v2620_v4, %v2606_v37  ;;  %v1461_v6 = vpop.permute.xlu0 %1460  ;;  %v1571_v11 = vpop.permute.xlu1 %1570 }
 0x560   : > { %v1466_v9 = vsel %vm911_vm3, %v1461_v6, 0  ;;  %v1576_v15 = vsel %vm911_vm3, %v1571_v11, 0 }
 0x561   : > { %v1349_v7 = vpack.c.bf16 %v1348_v5, %v1348_v5 }
 0x562   : > { %v2622_v8 = vpop.eup %2621 }
 0x563   : > { %2396 = vmatmul.mubr.msk.bf16.vlgmr.msra.gmra.mrb[28].mxu0 %vm895_vm4, %v1349_v7  ;;  %v1458_v10 = vmul.f32 %v2622_v8, %v2608_v39  ;;  %v1681_v17 = vpop.permute.xlu1 %1680 }
 0x564   : > { %2406 = vmatpush3.bf16.msra.mxu0 %v1466_v9  ;;  %2407 = vmatprep.mubr.msk.bf16.mxu0 %vm2807_vm1, %v2806_v13  ;;  %v1686_v20 = vsel %vm911_vm3, %v1681_v17, 0  ;;  %v2235_v9 = vld [vmem:[%s3413_s10] ss:$0 sm:$0xff] }
 0x565   : > { %2417 = vmatprep.subr.bf16.mxu0 %v2806_v13  ;;  %v1459_v12 = vpack.c.bf16 %v1458_v10, %v1458_v10 }
 0x566   : > { %v2624_v14 = vpop.eup %2623 }
 0x567   : > { %v1568_v16 = vmul.f32 %v2624_v14, %v3222_v40  ;;  %v2626_v19 = vpop.eup %2625 }
 0x568   : > { %v1678_v21 = vmul.f32 %v2626_v19, %v3225_v42 }
 0x569   : > { %v1569_v18 = vpack.c.bf16 %v1568_v16, %v1568_v16 }
 0x56a   : > { %v1679_v22 = vpack.c.bf16 %v1678_v21, %v1678_v21 }
 0x56b   : > { %2408 = vmatmul.mubr.msk.bf16.vlgmr.msra.gmra.mrb[32].mxu0 %vm895_vm4, %v1459_v12 }
 0x56c   : > { %2418 = vmatpush3.bf16.msra.mxu0 %v1576_v15  ;;  %2419 = vmatprep.mubr.msk.bf16.mxu0 %vm2807_vm1, %v2806_v13 }
 0x56d   : > { %2429 = vmatprep.subr.bf16.mxu0 %v2806_v13 }
 0x573   : > { %2420 = vmatmul.mubr.msk.bf16.vlgmr.msra.gmra.mrb[36].mxu0 %vm895_vm4, %v1569_v18 }
 0x574   : > { %2430 = vmatpush3.bf16.msra.mxu0 %v1686_v20  ;;  %2431 = vmatprep.mubr.msk.bf16.mxu0 %vm2807_vm1, %v2806_v13 }
 0x575   : > { %2443 = vmatprep.subr.bf16.mxu0 %v2806_v13 }
 0x57b   : > { %2432 = vmatmul.mubr.msk.bf16.vlgmr.msra.gmra.mrb[40].mxu0 %vm895_vm4, %v1679_v22 }
 0x57c   : > { %2447 = vmatprep.mubr.msk.bf16.mxu0 %vm2807_vm1, %v2806_v13 }
 0x587   : > { %v949_v23 = vpop.f32.mrb[12].mxu0 }
 0x588   : > { %v2349_v24 = vpop.f32.mrb[13].mxu0 }
 0x589   : > { %v952_v25 = vpop.f32.mrb[14].mxu0 }
 0x58a   : > { %v2350_v26 = vpop.f32.mrb[15].mxu0 }
 0x5f5   : > { %v1062_v27 = vpop.f32.mrb[16].mxu0 }
 0x5f6   : > { %1729 = vrot.lane.b32.xlu1 %v1062_v27, %s2815_s21  ;;  %v2361_v28 = vpop.f32.mrb[17].mxu0 }
 0x5f7   : > { %v1065_v29 = vpop.f32.mrb[18].mxu0  ;;  %v2239_v28 = vld [vmem:[%s3414_s11] ss:$0 sm:$0xff] }
 0x5f8   : > { %v2362_v30 = vpop.f32.mrb[19].mxu0 }
 0x5f9   : > { %v2240_v30 = vld [vmem:[%s3415_s12] ss:$0 sm:$0xff] }
 0x601   : > { %v1172_v31 = vpop.f32.mrb[20].mxu0 }
 0x602   : > { %1733 = vrot.lane.b32.xlu1 %v1172_v31, %s2816_s0  ;;  %v2373_v32 = vpop.f32.mrb[21].mxu0 }
 0x603   : > { %v1175_v33 = vpop.f32.mrb[22].mxu0 }
 0x604   : > { %v2374_v34 = vpop.f32.mrb[23].mxu0 }
 0x605   : > { %v2583_v34 = vld [vmem:[%s3418_s15] sm:$0xff]  }
 0x609   : > { %v1282_v35 = vpop.f32.mrb[24].mxu0 }
 0x60a   : > { %1737 = vrot.lane.b32.xlu1 %v1282_v35, %s2817_s6  ;;  %v2385_v36 = vpop.f32.mrb[25].mxu0  ;;  %v2584_v35 = vld [vmem:[%s3418_s15 + $0x8] sm:$0xff]   ;;  %s3461_s6 = sld [smem:[#allocation24_spill]] }
 0x60b   : > { %v1285_v37 = vpop.f32.mrb[26].mxu0  ;;  %v2585_v36 = vld [vmem:[%s3418_s15 + $0x10] sm:$0xff]  }
 0x60c   : > { %v2386_v38 = vpop.f32.mrb[27].mxu0  ;;  %v2586_v37 = vld [vmem:[%s3418_s15 + $0x18] sm:$0xff]  }
 0x60d   : > { %v2587_v38 = vld [vmem:[%s3418_s15 + $0x20] sm:$0xff]  }
 0x636   : > { %v1392_v39 = vpop.f32.mrb[28].mxu0 }
 0x637   : > { %1741 = vrot.lane.b32.xlu0 %v1392_v39, %s2818_s18  ;;  %v2397_v40 = vpop.f32.mrb[29].mxu0  ;;  %v2588_v39 = vld [vmem:[%s3418_s15 + $0x28] sm:$0xff]   ;;  %s3355_s18 = scalar_lea.hbm %s3461_s6, %s2256_s16 }
 0x638   : > { %v1395_v41 = vpop.f32.mrb[30].mxu0  ;;  %v2589_v40 = vld [vmem:[%s3418_s15 + $0x30] sm:$0xff]  }
 0x639   : > { %v2398_v42 = vpop.f32.mrb[31].mxu0  ;;  %v2590_v41 = vld [vmem:[%s3418_s15 + $0x38] sm:$0xff]  }
 0x63a   : > { %v2241_v42 = vld [vmem:[%s3417_s14] ss:$0 sm:$0xff] }
 0x63e   : > { %v1502_v44 = vpop.f32.mrb[32].mxu0 }
 0x63f   : > { %1745 = vrot.lane.b32.xlu1 %v1502_v44, %s2819_s17  ;;  %v2409_v45 = vpop.f32.mrb[33].mxu0  ;;  %s2719_s17 = sshll.u32 %s2822_s23, 4  ;;  %s2720_s17 = int_to_ptr.vmem [resolvable:$false] %s2719_s17 }
 0x640   : > { %v1505_v46 = vpop.f32.mrb[34].mxu0  ;;  %s2721_s24 = scalar_lea.vmem %s2720_s17, 256  ;;  %p2722_p11 = scmp.lt.s32.totalorder %s3357_s1, %s2720_s17 }
 0x641   : > { %v2410_v47 = vpop.f32.mrb[35].mxu0  ;;  %p2723_p3 = scmp.lt.s32.totalorder %s2721_s24, %s2715_s30 }
 0x643   : > { %p2724_p5 = por %p2723_p3, %p2722_p11 }
 0x645   : > { %p2725_p6 = pnand %p2724_p5, %p2718_p10 }
 0x646   : > { %v1612_v49 = vpop.f32.mrb[36].mxu0 }
 0x647   : > { %1749 = vrot.lane.b32.xlu0 %v1612_v49, %s2820_s19  ;;  %v2421_v51 = vpop.f32.mrb[37].mxu0 }
 0x648   : > { %v1615_v52 = vpop.f32.mrb[38].mxu0 }
 0x649   : > { %v2422_v50 = vpop.f32.mrb[39].mxu0 }
 0x64e   : > { %v1722_v53 = vpop.f32.mrb[40].mxu0 }
 0x64f   : > { %1753 = vrot.lane.b32.xlu1 %v1722_v53, %s2821_s22  ;;  %v2433_v54 = vpop.f32.mrb[41].mxu0 }
 0x650   : > { %v1725_v55 = vpop.f32.mrb[42].mxu0 }
 0x651   : > { %v2434_v56 = vpop.f32.mrb[43].mxu0 }
 0x668   : > { %v1730_v57 = vpop.permute.xlu1 %1729 }
 0x669   : > { %v1756_v61 = vsel %vm848_vm2, %v949_v23, %v1730_v57  ;;  %v2581_v23 = vld [vmem:[%s3416_s13] sm:$0xff]  }
 0x66a   : > { %2444 = vmatpush3.bf16.msra.mxu0 %v2581_v23 }
 0x66b   : > { %2445 = vmatprep.subr.bf16.mxu0 %v2806_v13 }
 0x674   : > { %v1734_v58 = vpop.permute.xlu1 %1733 }
 0x675   : > { %v1757_v62 = vsel %vm895_vm4, %v1756_v61, %v1734_v58 }
 0x67c   : > { %v1738_v59 = vpop.permute.xlu1 %1737 }
 0x67d   : > { %v1759_v1 = vsel %vm1758_vm5, %v1757_v62, %v1738_v59 }
 0x6a9   : > { %v1742_v60 = vpop.permute.xlu0 %1741 }
 0x6aa   : > { %v1761_v3 = vsel %vm1760_vm6, %v1759_v1, %v1742_v60 }
 0x6b1   : > { %v1746_v63 = vpop.permute.xlu1 %1745 }
 0x6b2   : > { %v1763_v4 = vsel %vm1762_vm7, %v1761_v3, %v1746_v63 }
 0x6b9   : > { %v1750_v2 = vpop.permute.xlu0 %1749 }
 0x6ba   : > { %v1765_v5 = vsel %vm1764_vm8, %v1763_v4, %v1750_v2 }
 0x6c1   : > { %v1754_v6 = vpop.permute.xlu1 %1753 }
 0x6c2   : > { %v1767_v7 = vsel %vm1766_vm9, %v1765_v5, %v1754_v6 }
 0x6c3   : > { %v1768_v8 = vpack.c.bf16 %v1767_v7, %v1767_v7 }
 0x6c5   : > { %2440 = vmatmul.mubr.msk.bf16.vlgmr.msra.gmra.mrb[32].mxu1 %vm603_vm0, %v1768_v8 }
 0x6c6   : > { %2467 = vmatprep.mubr.msk.bf16.mxu1 %vm2807_vm1, %v2806_v13  ;;  %2452 = vmatpush3.bf16.msra.mxu1 %v2583_v34 }
 0x6c7   : > { %2453 = vmatprep.subr.bf16.mxu1 %v2806_v13 }
 0x6ca   : > { %2454 = vmatpush3.bf16.msra.mxu1 %v2584_v35 }
 0x6cb   : > { %2455 = vmatprep.subr.bf16.mxu1 %v2806_v13 }
 0x6ce   : > { %2456 = vmatpush3.bf16.msra.mxu1 %v2585_v36 }
 0x6cf   : > { %2457 = vmatprep.subr.bf16.mxu1 %v2806_v13 }
 0x6d2   : > { %2458 = vmatpush3.bf16.msra.mxu1 %v2586_v37 }
 0x6d3   : > { %2459 = vmatprep.subr.bf16.mxu1 %v2806_v13 }
 0x6d6   : > { %2460 = vmatpush3.bf16.msra.mxu1 %v2587_v38 }
 0x6d7   : > { %2461 = vmatprep.subr.bf16.mxu1 %v2806_v13 }
 0x6da   : > { %2462 = vmatpush3.bf16.msra.mxu1 %v2588_v39 }
 0x6db   : > { %2463 = vmatprep.subr.bf16.mxu1 %v2806_v13 }
 0x6de   : > { %2464 = vmatpush3.bf16.msra.mxu1 %v2589_v40 }
 0x6df   : > { %2465 = vmatprep.subr.bf16.mxu1 %v2806_v13 }
 0x6e2   : > { %2466 = vmatpush3.bf16.msra.mxu1 %v2590_v41 }
 0x798   : > { %v1829_v10 = vpop.f32.mrb[32].mxu1 }
 0x799   : > { %v1830_v11 = vadd.f32 %v2235_v9, %v1829_v10  ;;  %v2441_v12 = vpop.f32.mrb[33].mxu1 }
 0x79a   : > { %v1832_v14 = vpop.f32.mrb[34].mxu1 }
 0x79b   : > { %v3292_v15 = vadd.f32 %v1830_v11, %v3067_v0  ;;  %v2442_v16 = vpop.f32.mrb[35].mxu1  ;;  %v2582_v0 = vld [vmem:[%s3416_s13 + $0x8] sm:$0xff]  }
 0x79c   : > { %2446 = vmatpush3.bf16.msra.mxu0 %v2582_v0  ;;  %v2246_v16 = vld [vmem:[%s3459_s29] ss:$0 sm:$0xff] }
 0x79d   : > { %v1838_v17 = vsel %vm603_vm0, %v3292_v15, 0.0 }
 0x79e   : > { %1839 = vadd.xlane.f32.xlu0 %v1838_v17 }
 0x82b   : > { %v1840_v18 = vpop.xlane.xlu0 %1839 }
 0x82c   : > { %v1841_v19 = vmul.f32 0.03125, %v1840_v18 }
 0x82e   : > { %v1842_v20 = vsub.f32 %v3292_v15, %v1841_v19 }
 0x830   : > { %v1843_v21 = vmul.f32 %v1842_v20, %v1842_v20 }
 0x832   : > { %v1844_v22 = vsel %vm603_vm0, %v1843_v21, 0.0 }
 0x833   : > { %1845 = vadd.xlane.f32.xlu1 %v1844_v22 }
 0x8c0   : > { %v1846_v24 = vpop.xlane.xlu1 %1845 }
 0x8c1   : > { %v1847_v25 = vmul.f32 0.03125, %v1846_v24 }
 0x8c3   : > { %v1848_v26 = vadd.f32 1e-05, %v1847_v25 }
 0x8c5   : > { %2627 = vrsqrt.f32 %v1848_v26 }
 0x8cf   : > { %v2628_v27 = vpop.eup %2627 }
 0x8d0   : > { %v1850_v29 = vmul.f32 %v2628_v27, %v1842_v20 }
 0x8d2   : > { %v1857_v31 = vmul.f32 %v2239_v28, %v1850_v29 }
 0x8d4   : > { %v1864_v32 = vadd.f32 %v2240_v30, %v1857_v31 }
 0x8d6   : > { %v1865_v33 = vpack.c.bf16 %v1864_v32, %v1864_v32 }
 0x8d8   : > { %2448 = vmatmul.mubr.msk.bf16.vlgmr.msra.gmra.mrb[44].mxu0 %vm603_vm0, %v1865_v33 }
 0x9ab   : > { %v1926_v43 = vpop.f32.mrb[44].mxu0 }
 0x9ac   : > { %v1927_v44 = vadd.f32 %v2241_v42, %v1926_v43  ;;  %v2449_v45 = vpop.f32.mrb[45].mxu0 }
 0x9ad   : > { %v1929_v46 = vpop.f32.mrb[46].mxu0 }
 0x9ae   : > { %v1933_v47 = vmul.f32 0.70710677, %v1927_v44  ;;  %v2450_v48 = vpop.f32.mrb[47].mxu0  ;;  %v1932_v10 = vmul.f32 0.5, %v1927_v44 }
 0x9b0   : > { %v2245_v49 = vclamps-f32 %v1933_v47, 4.0 }
 0x9b2   : > { %v1936_v51 = vmul.f32 %v2245_v49, %v2245_v49 }
 0x9b4   : > { %v1937_v52 = vmul.f32 -2.7261424e-10, %v1936_v51  ;;  %v1949_v50 = vmul.f32 -1.45660715e-05, %v1936_v51 }
 0x9b6   : > { %v1938_v13 = vadd.f32 2.7706815e-08, %v1937_v52  ;;  %v1950_v53 = vadd.f32 -0.00021337405, %v1949_v50 }
 0x9b8   : > { %v1939_v54 = vmul.f32 %v1938_v13, %v1936_v51  ;;  %v1951_v55 = vmul.f32 %v1950_v53, %v1936_v51 }
 0x9ba   : > { %v1940_v56 = vadd.f32 -2.101024e-06, %v1939_v54  ;;  %v1952_v57 = vadd.f32 -0.001682827, %v1951_v55 }
 0x9bc   : > { %v1941_v58 = vmul.f32 %v1940_v56, %v1936_v51  ;;  %v1953_v59 = vmul.f32 %v1952_v57, %v1936_v51 }
 0x9be   : > { %v1942_v60 = vadd.f32 -5.6925062e-05, %v1941_v58  ;;  %v1954_v61 = vadd.f32 -0.0073733293, %v1953_v59 }
 0x9c0   : > { %v1943_v62 = vmul.f32 %v1942_v60, %v1936_v51  ;;  %v1955_v63 = vmul.f32 %v1954_v61, %v1936_v51 }
 0x9c2   : > { %v1944_v1 = vadd.f32 -0.00073499064, %v1943_v62  ;;  %v1956_v2 = vadd.f32 -0.014264739, %v1955_v63 }
 0x9c4   : > { %v1945_v3 = vmul.f32 %v1944_v1, %v1936_v51  ;;  %2629 = vrcp.f32 %v1956_v2 }
 0x9c6   : > { %v1946_v4 = vadd.f32 -0.0029546, %v1945_v3 }
 0x9c8   : > { %v1947_v5 = vmul.f32 %v1946_v4, %v1936_v51 }
 0x9ca   : > { %v1948_v6 = vadd.f32 -0.016096033, %v1947_v5 }
 0x9cc   : > { %v1957_v7 = vmul.f32 %v2245_v49, %v1948_v6 }
 0x9ce   : > { %v2630_v8 = vpop.eup %2629 }
 0x9cf   : > { %v1959_v9 = vmul.f32 %v2630_v8, %v1957_v7 }
 0x9d1   : > { %v1960_v11 = vadd.f32 1.0, %v1959_v9 }
 0x9d3   : > { %v1961_v12 = vmul.f32 %v1960_v11, %v1932_v10 }
 0x9d5   : > { %v1962_v14 = vpack.c.bf16 %v1961_v12, %v1961_v12 }
 0x9d7   : > { %2468 = vmatmul.mubr.bf16.vlgmr.msra.gmra.mrb[36].mxu1 %v1962_v14 }
 0xaaa   : > { %v2068_v17 = vpop.f32.mrb[36].mxu1 }
 0xaab   : > { %v2069_v18 = vadd.f32 %v2246_v16, %v2068_v17  ;;  %v2469_v19 = vpop.f32.mrb[37].mxu1 }
 0xaac   : > { %v2071_v20 = vpop.f32.mrb[38].mxu1 }
 0xaad   : > { %v2074_v21 = vadd.f32 %v2069_v18, %v3292_v15  ;;  %v2470_v22 = vpop.f32.mrb[39].mxu1 }
 0xaaf   : > { %2075 = vst.msk [vmem:[%s591_s28] sm:$0xff] %vm603_vm0, %v2074_v21 }
 0xab0   : > { %2728 = shalt.err (!%p2725_p6)
}
 0xab1   : > { %s2729_s26 = scalar_lea.hbm %s3355_s18, 128  ;;  %s2733_s29 = scalar_lea.hbm %s3461_s6, 256 }
 0xab2   : > { %p2730_p7 = scmp.ne.s32.totalorder %s3355_s18, %s2729_s26  ;;  %p2734_p0 = scmp.lt.u32.totalorder %s3355_s18, %s3461_s6 }
 0xab3   : > { %p2735_p2 = scmp.lt.u32.totalorder %s2733_s29, %s2729_s26  ;;  %p2737_p13 = scmp.lt.u32.totalorder %s2729_s26, %s3355_s18 }
 0xab4   : > { %p2731_p9 = pnand %p2730_p7, %p3462_p4 }
 0xab5   : > { %p2736_p1 = por %p2735_p2, %p2734_p0 }
 0xab6   : > { %p2732_p12 = pneg %p2731_p9 }
 0xab7   : > { %p2738_p8 = por %p2737_p13, %p2736_p1 }
 0xab9   : > { %p2739_p10 = pnand %p2738_p8, %p2732_p12 }
 0xabb   : > { %2742 = shalt.err (!%p2739_p10)
}
 0xabc   : > { %2483 = dma.vmem_to_hbm [thread:$0]  (%p3462_p4), %s3357_s1, 128, %s3355_s18, %s2077_s27  }
 0xabd PF: > { %s3463_s21 = sld [smem:[#allocation15_spill]]  ;;  %s3464_s0 = sld [smem:[#allocation12_spill]] }
 0xabe   : > { %s3465_s30 = sld [smem:[#allocation18_spill]] }
 0xac3   : > { %p2505_p11 = scmp.ge.s32.totalorder %s3463_s21, 2  ;;  %s2103_s23 = sand.u32 1, %s3464_s0  }
 0xac4   : > { %p3466_p3 = scmp.ne.s32.totalorder %s3465_s30, 0  ;;  %s2104_s17 = scalar_lea.sflag [#allocation4], %s2103_s23 }
 0xac6   : > { %p2496_p5 = pnand %p2505_p11, %p3466_p3 }
 0xac8   : > { %2776 = dma.done.wait (!%p2496_p5), %s2104_s17, 128  }
 0xac9   : > { %2778 = vsyncadd (!%p2496_p5), %s2104_s17, 4294967168  ;;  %s32_s29 = sadd.s32 1, %s3463_s21   ;;  %s3467_s26 = sld [smem:[#allocation13_spill]] }
 0xaca   : > { %p29_p6 = scmp.ge.s32.totalorder %s32_s29, 4   ;;  %s3468_s20 = sld [smem:[#allocation19_spill]] }
 0xacb   : > { %s3469_s27 = sld [smem:[#allocation14_spill]]  ;;  %s3470_s28 = sld [smem:[#allocation16_spill]] }
 0xacc   : > { %s3471_s24 = smov %s2785_s25  ;;  %31 = sbr.rel (!%p29_p6) target bundleno = 12 (0xc), region = 137 }
 0xacf   : > { %s3472_s25 = smov %s3467_s26 }
 0xad0   : > { %s3473_s26 = smov %s3468_s20 }
 0xad3   :  { %2109 = vsyncpa [#allocation3], 1 }
 0xad4   :  { %2111 = vsyncpa [#allocation3 + $0x1], 1 }
 0xad5   :  { %2112 = vsyncpa [#allocation6], 1 }
 0xad6   :  { %2113 = vsyncpa [#allocation4], 1 }
 0xad7   :  { %2115 = vsyncpa [#allocation4 + $0x1], 1 }

</bundles_post_ra>
